<compile_context>
chip_gen: v7x
topology: tpu7x:2x2x1
jax: 0.10.0
libtpu: 0.0.40
codegen_flags: <defaults>
</compile_context>

<pallas_src>
import functools

import jax
import jax.numpy as jnp
import numpy as np
from jax.experimental import pallas as pl
from jax.experimental.pallas import tpu as pltpu


def _round_up(n, m):
    return ((n + m - 1) // m) * m


def _pick_tile_g(G, max_tile=2048):
    """Choose (tile_g, g_pad) minimizing streamed zero-padding on the w3 axis."""
    g128 = _round_up(G, 128)
    if g128 <= max_tile:
        return g128, g128                       # single tile, no extra padding
    # Largest multiple-of-128 tile <= max_tile that divides g128 exactly.
    for t in range(max_tile, 511, -128):
        if g128 % t == 0:
            return t, g128
    # Otherwise accept the tile (1024/1536/2048) with the least padding.
    pad, t = min(((-g128) % t, t) for t in (2048, 1536, 1024))
    return t, g128 + pad


# ---------------------------------------------------------------------------
# Kernel 1: capsule-norm argmax mask + first two MLP layers (tiny; one step).
# ---------------------------------------------------------------------------
def frontend_kernel(x_ref, w1_ref, b1_ref, w2_ref, b2_ref,
                    masked_ref, h2_ref, *, C, D):
    B = x_ref.shape[0]
    CD = C * D
    x = x_ref[...]                                        # (B, CD) f32
    xx = x * x
    lane = jax.lax.broadcasted_iota(jnp.int32, (B, CD), 1)

    # Per-class squared L2 sums + running argmax.  sqrt/softmax are strictly
    # monotonic so the argmax of the squared sums matches the module; strict
    # ">" reproduces torch.max first-occurrence tie-breaking.  All f32.
    best = jnp.sum(jnp.where(lane < D, xx, 0.0), axis=1, keepdims=True)
    idx = jnp.zeros((B, 1), jnp.int32)
    for c in range(1, C):
        m = (lane >= c * D) & (lane < (c + 1) * D)
        s = jnp.sum(jnp.where(m, xx, 0.0), axis=1, keepdims=True)
        take = s > best
        idx = jnp.where(take, jnp.int32(c), idx)
        best = jnp.where(take, s, best)

    # Lane-dense one-hot (padded to 128 lanes; the wrapper slices [:C]).
    lane_c = jax.lax.broadcasted_iota(jnp.int32, masked_ref.shape, 1)
    masked_ref[...] = (lane_c == idx).astype(jnp.float32)

    # t = (x * masked[:, :, None, None]).view(B, -1) without a selector matmul.
    lo = idx * D
    t = jnp.where((lane >= lo) & (lane < lo + D), x, 0.0)

    # Linear -> ReLU -> Linear -> ReLU  (bf16 weights, f32 accumulation).
    h1 = jnp.dot(t.astype(jnp.bfloat16), w1_ref[...],
                 preferred_element_type=jnp.float32) + b1_ref[...]
    h1 = jnp.maximum(h1, 0.0)
    h2 = jnp.dot(h1.astype(jnp.bfloat16), w2_ref[...],
                 preferred_element_type=jnp.float32) + b2_ref[...]
    h2_ref[...] = jnp.maximum(h2, 0.0)


# ---------------------------------------------------------------------------
# Kernel 2: third layer tiled over output genes.  Pure w3 weight streaming;
# the G grid axis is "parallel" (splits across both TensorCores on v7x).
# ---------------------------------------------------------------------------
def genes_kernel(h2_ref, w3_ref, b3_ref, recon_ref):
    logits = jnp.dot(h2_ref[...].astype(jnp.bfloat16), w3_ref[...],
                     preferred_element_type=jnp.float32) + b3_ref[...]
    recon_ref[...] = jax.nn.sigmoid(logits).astype(recon_ref.dtype)


def prepare_decoder_params(params, *, max_tile_g=2048):
    """One-time weight preparation (bf16 cast + G padding).

    Call once and reuse across forward calls; doing the cast/pad per call
    would re-read the full f32 w3 from HBM on every forward.
    """
    w1, b1, w2, b2, w3, b3 = params
    G = w3.shape[1]
    tile_g, g_pad = _pick_tile_g(G, max_tile_g)
    return dict(
        w1=jnp.asarray(w1, jnp.bfloat16),
        b1=jnp.asarray(b1, jnp.float32).reshape(1, -1),
        w2=jnp.asarray(w2, jnp.bfloat16),
        b2=jnp.asarray(b2, jnp.float32).reshape(1, -1),
        w3=jnp.pad(jnp.asarray(w3, jnp.float32),
                   ((0, 0), (0, g_pad - G))).astype(jnp.bfloat16),
        b3=jnp.pad(jnp.asarray(b3, jnp.float32).reshape(1, -1),
                   ((0, 0), (0, g_pad - G))),
        G=G, tile_g=tile_g, g_pad=g_pad,
    )


def decoder_forward(x, prepared, *, out_dtype=jnp.float32):
    """x: (B, C, D, 1) float32. Returns (reconstructions (B, G), masked (B, C))."""
    B, C, D, _ = x.shape
    CD = C * D
    w1, b1 = prepared["w1"], prepared["b1"]
    w2, b2 = prepared["w2"], prepared["b2"]
    w3, b3 = prepared["w3"], prepared["b3"]
    G, tile_g, g_pad = prepared["G"], prepared["tile_g"], prepared["g_pad"]
    H1, H2 = w1.shape[1], w2.shape[1]
    c_pad = _round_up(C, 128)

    x_flat = x.reshape(B, CD).astype(jnp.float32)

    # ---- stage 1: argmax mask + first two layers (tiny, single grid step) ----
    masked_pad, h2 = pl.pallas_call(
        functools.partial(frontend_kernel, C=C, D=D),
        out_shape=(jax.ShapeDtypeStruct((B, c_pad), jnp.float32),
                   jax.ShapeDtypeStruct((B, H2), jnp.float32)),
        grid=(1,),
        in_specs=[
            pl.BlockSpec((B, CD), lambda i: (0, 0)),     # x
            pl.BlockSpec((CD, H1), lambda i: (0, 0)),    # w1 (bf16)
            pl.BlockSpec((1, H1), lambda i: (0, 0)),     # b1
            pl.BlockSpec((H1, H2), lambda i: (0, 0)),    # w2 (bf16)
            pl.BlockSpec((1, H2), lambda i: (0, 0)),     # b2
        ],
        out_specs=(pl.BlockSpec((B, c_pad), lambda i: (0, 0)),   # masked (lane-dense)
                   pl.BlockSpec((B, H2), lambda i: (0, 0))),     # h2
    )(x_flat, w1, b1, w2, b2)

    # ---- stage 2: dominant third layer, tiled + parallel over G --------------
    num_tiles = g_pad // tile_g
    out_bytes = jnp.dtype(out_dtype).itemsize
    cost = pl.CostEstimate(
        flops=2 * B * H2 * g_pad,
        transcendentals=B * g_pad,
        bytes_accessed=(w3.size * 2 + b3.size * 4 + B * H2 * 4
                        + B * g_pad * out_bytes),
    )

    recon_pad = pl.pallas_call(
        genes_kernel,
        out_shape=jax.ShapeDtypeStruct((B, g_pad), out_dtype),
        grid=(num_tiles,),
        in_specs=[
            pl.BlockSpec((B, H2), lambda g: (0, 0)),        # h2 (resident)
            pl.BlockSpec((H2, tile_g), lambda g: (0, g)),   # w3 tile (bf16)
            pl.BlockSpec((1, tile_g), lambda g: (0, g)),    # b3 tile
        ],
        out_specs=pl.BlockSpec((B, tile_g), lambda g: (0, g)),
        compiler_params=pltpu.CompilerParams(
            dimension_semantics=("parallel",)),
        cost_estimate=cost,
    )(h2, w3, b3)

    # Padded recon columns hold sigmoid(0)=0.5 and padded masked lanes hold 0;
    # always return through these slices.
    return recon_pad[:, :G], masked_pad[:, :C]


def init_decoder_params(key, in_dim, output_genes):
    """Deterministic init mirroring nn.Linear (uniform(-1/sqrt(fan_in), +))."""
    dims = [(in_dim, 512), (512, 1024), (1024, output_genes)]
    params = []
    for fan_in, fan_out in dims:
        key, kw, kb = jax.random.split(key, 3)
        bound = 1.0 / np.sqrt(fan_in)
        w = jax.random.uniform(kw, (fan_in, fan_out), jnp.float32, -bound, bound)
        b = jax.random.uniform(kb, (1, fan_out), jnp.float32, -bound, bound)
        params += [w, b]
    return tuple(params)


def decoder_reference(x, params):
    """Pure-JAX reference (mirrors the PyTorch module) for correctness checking."""
    B, C, D, _ = x.shape
    w1, b1, w2, b2, w3, b3 = params
    xs = x[..., 0]                                          # (B, C, D)
    classes = jnp.sqrt(jnp.sum(xs ** 2, axis=2))            # (B, C)
    classes = jax.nn.softmax(classes, axis=1)
    idx = jnp.argmax(classes, axis=1)                       # (B,)
    masked = jax.nn.one_hot(idx, C, dtype=jnp.float32)      # (B, C)
    t = (xs * masked[:, :, None]).reshape(B, -1)            # (B, C*D)
    h1 = jax.nn.relu(t @ w1 + b1)
    h2 = jax.nn.relu(h1 @ w2 + b2)
    recon = jax.nn.sigmoid(h2 @ w3 + b3)
    return recon, masked


if __name__ == "__main__":
    # Module-consistent small shapes: batch=2, classes_num=4, dc_dim_caps=16,
    # output_genes=784 (module default; hidden 512/1024 fixed by the module).
    B, CLASSES, DIM_CAPS, OUTPUT_GENES = 2, 4, 16, 784

    key = jax.random.PRNGKey(0)
    kx, kp = jax.random.split(key)
    x = jax.random.normal(kx, (B, CLASSES, DIM_CAPS, 1), jnp.float32)
    params = init_decoder_params(kp, DIM_CAPS * CLASSES, OUTPUT_GENES)

    prepared = prepare_decoder_params(params)     # one-time bf16 cast + pad
    recon, masked = decoder_forward(x, prepared)
    recon = jax.block_until_ready(recon)
    masked = jax.block_until_ready(masked)
    assert recon.shape == (B, OUTPUT_GENES) and masked.shape == (B, CLASSES)

    # Reference uses the same bf16-rounded weights that the kernel streams, so
    # the check isolates kernel correctness from the deliberate bf16 weight
    # quantization (residual error is only from bf16 activation rounding).
    qparams = tuple(p.astype(jnp.bfloat16).astype(jnp.float32) if i % 2 == 0 else p
                    for i, p in enumerate(params))
    recon_ref, masked_ref = decoder_reference(x, qparams)
    np.testing.assert_allclose(np.asarray(masked), np.asarray(masked_ref),
                               rtol=0, atol=0)
    np.testing.assert_allclose(np.asarray(recon), np.asarray(recon_ref),
                               rtol=2e-3, atol=2e-3)
    print("KERNEL_OK")
</pallas_src>

<mosaic_0001>
module attributes {stable_mosaic.version = 11 : i64} {
  func.func @frontend_kernel(%arg0: i32, %arg1: memref<2x64xf32, #tpu.memory_space<vmem>>, %arg2: memref<64x512xbf16, #tpu.memory_space<vmem>>, %arg3: memref<1x512xf32, #tpu.memory_space<vmem>>, %arg4: memref<512x1024xbf16, #tpu.memory_space<vmem>>, %arg5: memref<1x1024xf32, #tpu.memory_space<vmem>>, %arg6: memref<2x128xf32, #tpu.memory_space<vmem>>, %arg7: memref<2x1024xf32, #tpu.memory_space<vmem>>) attributes {dimension_semantics = [#tpu.dimension_semantics<arbitrary>], iteration_bounds = array<i64: 1>, scalar_prefetch = 0 : i64, scratch_operands = 0 : i64, tpu.core_type = #tpu.core_type<tc>, window_params = [{pipeline_mode = #tpu.pipeline_mode<synchronous>, transform_indices = @transform_0, window_bounds = array<i64: 2, 64>}, {pipeline_mode = #tpu.pipeline_mode<synchronous>, transform_indices = @transform_1, window_bounds = array<i64: 64, 512>}, {pipeline_mode = #tpu.pipeline_mode<synchronous>, transform_indices = @transform_2, window_bounds = array<i64: 1, 512>}, {pipeline_mode = #tpu.pipeline_mode<synchronous>, transform_indices = @transform_3, window_bounds = array<i64: 512, 1024>}, {pipeline_mode = #tpu.pipeline_mode<synchronous>, transform_indices = @transform_4, window_bounds = array<i64: 1, 1024>}, {pipeline_mode = #tpu.pipeline_mode<synchronous>, transform_indices = @transform_5, window_bounds = array<i64: 2, 128>}, {pipeline_mode = #tpu.pipeline_mode<synchronous>, transform_indices = @transform_6, window_bounds = array<i64: 2, 1024>}]} {
    %c0 = arith.constant 0 : index
    %c0_0 = arith.constant 0 : index
    %0 = vector.load %arg1[%c0, %c0_0] : memref<2x64xf32, #tpu.memory_space<vmem>>, vector<2x64xf32>
    %1 = arith.mulf %0, %0 : vector<2x64xf32>
    %2 = tpu.iota {dimensions = array<i32: 1>} : vector<2x64xi32>
    %c16_i32 = arith.constant 16 : i32
    %3 = vector.broadcast %c16_i32 : i32 to vector<2x64xi32>
    %4 = arith.cmpi slt, %2, %3 : vector<2x64xi32>
    %cst = arith.constant 0.000000e+00 : f32
    %5 = vector.broadcast %cst : f32 to vector<2x64xf32>
    %6 = arith.select %4, %1, %5 : vector<2x64xi1>, vector<2x64xf32>
    %cst_1 = arith.constant dense<0.000000e+00> : vector<2xf32>
    %7 = vector.multi_reduction <add>, %6, %cst_1 [1] : vector<2x64xf32> to vector<2xf32>
    %8 = vector.shape_cast %7 : vector<2xf32> to vector<2x1xf32>
    %c0_i32 = arith.constant 0 : i32
    %9 = vector.broadcast %c0_i32 : i32 to vector<2x1xi32>
    %c16_i32_2 = arith.constant 16 : i32
    %10 = vector.broadcast %c16_i32_2 : i32 to vector<2x64xi32>
    %11 = arith.cmpi sge, %2, %10 : vector<2x64xi32>
    %c32_i32 = arith.constant 32 : i32
    %12 = vector.broadcast %c32_i32 : i32 to vector<2x64xi32>
    %13 = arith.cmpi slt, %2, %12 : vector<2x64xi32>
    %14 = arith.andi %11, %13 : vector<2x64xi1>
    %cst_3 = arith.constant 0.000000e+00 : f32
    %15 = vector.broadcast %cst_3 : f32 to vector<2x64xf32>
    %16 = arith.select %14, %1, %15 : vector<2x64xi1>, vector<2x64xf32>
    %cst_4 = arith.constant dense<0.000000e+00> : vector<2xf32>
    %17 = vector.multi_reduction <add>, %16, %cst_4 [1] : vector<2x64xf32> to vector<2xf32>
    %18 = vector.shape_cast %17 : vector<2xf32> to vector<2x1xf32>
    %19 = arith.cmpf ogt, %18, %8 : vector<2x1xf32>
    %c1_i32 = arith.constant 1 : i32
    %20 = vector.broadcast %c1_i32 : i32 to vector<2x1xi32>
    %21 = arith.select %19, %20, %9 : vector<2x1xi1>, vector<2x1xi32>
    %22 = arith.select %19, %18, %8 : vector<2x1xi1>, vector<2x1xf32>
    %c32_i32_5 = arith.constant 32 : i32
    %23 = vector.broadcast %c32_i32_5 : i32 to vector<2x64xi32>
    %24 = arith.cmpi sge, %2, %23 : vector<2x64xi32>
    %c48_i32 = arith.constant 48 : i32
    %25 = vector.broadcast %c48_i32 : i32 to vector<2x64xi32>
    %26 = arith.cmpi slt, %2, %25 : vector<2x64xi32>
    %27 = arith.andi %24, %26 : vector<2x64xi1>
    %cst_6 = arith.constant 0.000000e+00 : f32
    %28 = vector.broadcast %cst_6 : f32 to vector<2x64xf32>
    %29 = arith.select %27, %1, %28 : vector<2x64xi1>, vector<2x64xf32>
    %cst_7 = arith.constant dense<0.000000e+00> : vector<2xf32>
    %30 = vector.multi_reduction <add>, %29, %cst_7 [1] : vector<2x64xf32> to vector<2xf32>
    %31 = vector.shape_cast %30 : vector<2xf32> to vector<2x1xf32>
    %32 = arith.cmpf ogt, %31, %22 : vector<2x1xf32>
    %c2_i32 = arith.constant 2 : i32
    %33 = vector.broadcast %c2_i32 : i32 to vector<2x1xi32>
    %34 = arith.select %32, %33, %21 : vector<2x1xi1>, vector<2x1xi32>
    %35 = arith.select %32, %31, %22 : vector<2x1xi1>, vector<2x1xf32>
    %c48_i32_8 = arith.constant 48 : i32
    %36 = vector.broadcast %c48_i32_8 : i32 to vector<2x64xi32>
    %37 = arith.cmpi sge, %2, %36 : vector<2x64xi32>
    %c64_i32 = arith.constant 64 : i32
    %38 = vector.broadcast %c64_i32 : i32 to vector<2x64xi32>
    %39 = arith.cmpi slt, %2, %38 : vector<2x64xi32>
    %40 = arith.andi %37, %39 : vector<2x64xi1>
    %cst_9 = arith.constant 0.000000e+00 : f32
    %41 = vector.broadcast %cst_9 : f32 to vector<2x64xf32>
    %42 = arith.select %40, %1, %41 : vector<2x64xi1>, vector<2x64xf32>
    %cst_10 = arith.constant dense<0.000000e+00> : vector<2xf32>
    %43 = vector.multi_reduction <add>, %42, %cst_10 [1] : vector<2x64xf32> to vector<2xf32>
    %44 = vector.shape_cast %43 : vector<2xf32> to vector<2x1xf32>
    %45 = arith.cmpf ogt, %44, %35 : vector<2x1xf32>
    %c3_i32 = arith.constant 3 : i32
    %46 = vector.broadcast %c3_i32 : i32 to vector<2x1xi32>
    %47 = arith.select %45, %46, %34 : vector<2x1xi1>, vector<2x1xi32>
    %48 = tpu.iota {dimensions = array<i32: 1>} : vector<2x128xi32>
    %49 = vector.broadcast %47 : vector<2x1xi32> to vector<2x128xi32>
    %50 = arith.cmpi eq, %48, %49 : vector<2x128xi32>
    %51 = arith.extui %50 : vector<2x128xi1> to vector<2x128xi32>
    %52 = arith.sitofp %51 : vector<2x128xi32> to vector<2x128xf32>
    %c0_11 = arith.constant 0 : index
    %c0_12 = arith.constant 0 : index
    %53 = vector.load %arg6[%c0_11, %c0_12] : memref<2x128xf32, #tpu.memory_space<vmem>>, vector<2x128xf32>
    tpu.vector_store %arg6[%c0_11, %c0_12], %52 {strides = array<i32>} : memref<2x128xf32, #tpu.memory_space<vmem>>, vector<2x128xf32>,
    %c16_i32_13 = arith.constant 16 : i32
    %54 = vector.broadcast %c16_i32_13 : i32 to vector<2x1xi32>
    %55 = arith.muli %47, %54 : vector<2x1xi32>
    %56 = vector.broadcast %55 : vector<2x1xi32> to vector<2x64xi32>
    %57 = arith.cmpi sge, %2, %56 : vector<2x64xi32>
    %c16_i32_14 = arith.constant 16 : i32
    %58 = vector.broadcast %c16_i32_14 : i32 to vector<2x1xi32>
    %59 = arith.addi %55, %58 : vector<2x1xi32>
    %60 = vector.broadcast %59 : vector<2x1xi32> to vector<2x64xi32>
    %61 = arith.cmpi slt, %2, %60 : vector<2x64xi32>
    %62 = arith.andi %57, %61 : vector<2x64xi1>
    %cst_15 = arith.constant 0.000000e+00 : f32
    %63 = vector.broadcast %cst_15 : f32 to vector<2x64xf32>
    %64 = arith.select %62, %0, %63 : vector<2x64xi1>, vector<2x64xf32>
    %65 = arith.truncf %64 : vector<2x64xf32> to vector<2x64xbf16>
    %c0_16 = arith.constant 0 : index
    %c0_17 = arith.constant 0 : index
    %66 = vector.load %arg2[%c0_16, %c0_17] : memref<64x512xbf16, #tpu.memory_space<vmem>>, vector<64x512xbf16>
    %cst_18 = arith.constant dense<0.000000e+00> : vector<2x512xf32>
    %67 = tpu.matmul %65, %66, %cst_18 {dimension_numbers = #tpu.dot_dimension_numbers<[1], [0], [0], [1], [0, 0, 1, 1], [], []>} : vector<2x64xbf16>, vector<64x512xbf16>, vector<2x512xf32> -> vector<2x512xf32>
    %c0_19 = arith.constant 0 : index
    %c0_20 = arith.constant 0 : index
    %68 = vector.load %arg3[%c0_19, %c0_20] : memref<1x512xf32, #tpu.memory_space<vmem>>, vector<1x512xf32>
    %69 = vector.broadcast %68 : vector<1x512xf32> to vector<2x512xf32>
    %70 = arith.addf %67, %69 : vector<2x512xf32>
    %cst_21 = arith.constant 0.000000e+00 : f32
    %71 = vector.broadcast %cst_21 : f32 to vector<2x512xf32>
    %72 = arith.maximumf %70, %71 : vector<2x512xf32>
    %73 = arith.truncf %72 : vector<2x512xf32> to vector<2x512xbf16>
    %c0_22 = arith.constant 0 : index
    %c0_23 = arith.constant 0 : index
    %74 = vector.load %arg4[%c0_22, %c0_23] : memref<512x1024xbf16, #tpu.memory_space<vmem>>, vector<512x1024xbf16>
    %cst_24 = arith.constant dense<0.000000e+00> : vector<2x1024xf32>
    %75 = tpu.matmul %73, %74, %cst_24 {dimension_numbers = #tpu.dot_dimension_numbers<[1], [0], [0], [1], [0, 0, 1, 1], [], []>} : vector<2x512xbf16>, vector<512x1024xbf16>, vector<2x1024xf32> -> vector<2x1024xf32>
    %c0_25 = arith.constant 0 : index
    %c0_26 = arith.constant 0 : index
    %76 = vector.load %arg5[%c0_25, %c0_26] : memref<1x1024xf32, #tpu.memory_space<vmem>>, vector<1x1024xf32>
    %77 = vector.broadcast %76 : vector<1x1024xf32> to vector<2x1024xf32>
    %78 = arith.addf %75, %77 : vector<2x1024xf32>
    %cst_27 = arith.constant 0.000000e+00 : f32
    %79 = vector.broadcast %cst_27 : f32 to vector<2x1024xf32>
    %80 = arith.maximumf %78, %79 : vector<2x1024xf32>
    %c0_28 = arith.constant 0 : index
    %c0_29 = arith.constant 0 : index
    %81 = vector.load %arg7[%c0_28, %c0_29] : memref<2x1024xf32, #tpu.memory_space<vmem>>, vector<2x1024xf32>
    tpu.vector_store %arg7[%c0_28, %c0_29], %80 {strides = array<i32>} : memref<2x1024xf32, #tpu.memory_space<vmem>>, vector<2x1024xf32>,
    return
  }
  func.func @transform_0(%arg0: i32) -> (i32, i32) {
    %c0_i32 = arith.constant 0 : i32
    %c0_i32_0 = arith.constant 0 : i32
    %c0_i32_1 = arith.constant 0 : i32
    return %c0_i32, %c0_i32_0 : i32, i32
  }
  func.func @transform_1(%arg0: i32) -> (i32, i32) {
    %c0_i32 = arith.constant 0 : i32
    %c0_i32_0 = arith.constant 0 : i32
    %c0_i32_1 = arith.constant 0 : i32
    return %c0_i32, %c0_i32_0 : i32, i32
  }
  func.func @transform_2(%arg0: i32) -> (i32, i32) {
    %c0_i32 = arith.constant 0 : i32
    %c0_i32_0 = arith.constant 0 : i32
    %c0_i32_1 = arith.constant 0 : i32
    return %c0_i32, %c0_i32_0 : i32, i32
  }
  func.func @transform_3(%arg0: i32) -> (i32, i32) {
    %c0_i32 = arith.constant 0 : i32
    %c0_i32_0 = arith.constant 0 : i32
    %c0_i32_1 = arith.constant 0 : i32
    return %c0_i32, %c0_i32_0 : i32, i32
  }
  func.func @transform_4(%arg0: i32) -> (i32, i32) {
    %c0_i32 = arith.constant 0 : i32
    %c0_i32_0 = arith.constant 0 : i32
    %c0_i32_1 = arith.constant 0 : i32
    return %c0_i32, %c0_i32_0 : i32, i32
  }
  func.func @transform_5(%arg0: i32) -> (i32, i32) {
    %c0_i32 = arith.constant 0 : i32
    %c0_i32_0 = arith.constant 0 : i32
    %c0_i32_1 = arith.constant 0 : i32
    return %c0_i32, %c0_i32_0 : i32, i32
  }
  func.func @transform_6(%arg0: i32) -> (i32, i32) {
    %c0_i32 = arith.constant 0 : i32
    %c0_i32_0 = arith.constant 0 : i32
    %c0_i32_1 = arith.constant 0 : i32
    return %c0_i32, %c0_i32_0 : i32, i32
  }
}

</mosaic_0001>

<bundles_post_ra>
// kernel: tpu_custom_call.1
= control target key start
LH: loop header
LB: loop body
LE: loop exit
PB: predicated region body
PF: predicated region fallthrough
CT: control target
= control target key end

     0   :  { %12 = vsyncpa [#allocation3], 0  ;;  %s2967_s0 = inlined_call_operand.hbm [shape: f32[2,64], index: 0, kind: input, shape index: {}]   ;;  %s2968_s1 = inlined_call_operand.hbm [shape: bf16[64,512], index: 1, kind: input, shape index: {}]   ;;  %s2969_s2 = inlined_call_operand.vmem [shape: f32[1,512], index: 2, kind: input, shape index: {}]   ;;  %s2970_s3 = inlined_call_operand.hbm [shape: bf16[512,1024], index: 3, kind: input, shape index: {}]   ;;  %s2971_s4 = inlined_call_operand.vmem [shape: f32[1,1024], index: 4, kind: input, shape index: {}]   ;;  %s2972_s5 = inlined_call_operand.hbm [shape: f32[2,128], index: 5, kind: output, shape index: {0}]   ;;  %s2973_s6 = inlined_call_operand.hbm [shape: f32[2,1024], index: 6, kind: output, shape index: {1}]  }
   0x1   :  { %13 = vsyncpa [#allocation6], 0 }
   0x2   :  { %14 = vsyncpa [#allocation4], 0 }
   0x3   :  { %15 = vsyncpa [#allocation10], 0  ;;  %s2769_s21 = smov [#allocation5]   ;;  %s2651_s25 = scalar_lea.hbm %s2968_s1, 2048 }
   0x4   :  { %s31_s22 = sshll.u32 %s2769_s21, 4  ;;  %p2652_p0 = scmp.ne.s32.totalorder %s2968_s1, %s2651_s25  ;;  %s32_s22 = int_to_ptr.vmem [resolvable:$true] %s31_s22 }
   0x5   :  { %p2655_p1 = scmp.lt.u32.totalorder %s2651_s25, %s2968_s1 }
   0x7   :  { %p2657_p2 = pnand %p2655_p1, %p2652_p0 }
   0x9   :  { %2660 = shalt.err (!%p2657_p2)
}
   0xa   :  { %s2661_s30 = scalar_lea.vmem %s32_s22, 2048  ;;  %p2666_p4 = scmp.lt.s32.totalorder %s32_s22, %s32_s22 }
   0xb   :  { %p2662_p3 = scmp.ne.s32.totalorder %s32_s22, %s2661_s30  ;;  %p2667_p5 = scmp.lt.s32.totalorder %s2661_s30, %s2661_s30 }
   0xd   :  { %p2668_p6 = por %p2667_p5, %p2666_p4 }
   0xf   :  { %p2669_p7 = pnand %p2668_p6, %p2662_p3 }
  0x11   :  { %2672 = shalt.err (!%p2669_p7)
}
  0x12   :  { %s2770_s7 = smov 256   ;;  %s2771_s8 = smov 16  }
  0x13   :  { %37 = dma.hbm_to_vmem [thread:$0]  %s2968_s1, 2048, %s32_s22, [#allocation6], %s2770_s7, %s2770_s7, %s2771_s8  }
  0x14   :  { %s2772_s11 = smov [#allocation2]   ;;  %s2773_s13 = smov [#allocation7]  }
  0x15   :  { %s22_s12 = sshll.u32 %s2772_s11, 4  ;;  %s45_s14 = sshll.u32 %s2773_s13, 4  ;;  %s23_s12 = int_to_ptr.vmem [resolvable:$true] %s22_s12  ;;  %s46_s14 = int_to_ptr.vmem [resolvable:$true] %s45_s14 }
  0x16   :  { %s2673_s17 = scalar_lea.hbm %s2967_s0, 32 }
  0x17   :  { %p2674_p8 = scmp.ne.s32.totalorder %s2967_s0, %s2673_s17  ;;  %p2677_p9 = scmp.lt.u32.totalorder %s2673_s17, %s2967_s0 }
  0x19   :  { %p2679_p10 = pnand %p2677_p9, %p2674_p8 }
  0x1b   :  { %2682 = shalt.err (!%p2679_p10)
}
  0x1c   :  { %s2683_s1 = scalar_lea.vmem %s23_s12, 32  ;;  %p2688_p12 = scmp.lt.s32.totalorder %s23_s12, %s23_s12 }
  0x1d   :  { %p2684_p11 = scmp.ne.s32.totalorder %s23_s12, %s2683_s1  ;;  %p2689_p13 = scmp.lt.s32.totalorder %s2683_s1, %s2683_s1 }
  0x1f   :  { %p2690_p0 = por %p2689_p13, %p2688_p12 }
  0x21   :  { %p2691_p1 = pnand %p2690_p0, %p2684_p11 }
  0x23   :  { %2694 = shalt.err (!%p2691_p1)
}
  0x24   :  { %25 = dma.hbm_to_vmem [thread:$0]  %s2967_s0, 32, %s23_s12, [#allocation3]  }
  0x25   :  { %s2695_s26 = scalar_lea.hbm %s2970_s3, 32768 }
  0x26   :  { %p2696_p2 = scmp.ne.s32.totalorder %s2970_s3, %s2695_s26  ;;  %p2699_p3 = scmp.lt.u32.totalorder %s2695_s26, %s2970_s3 }
  0x28   :  { %p2701_p4 = pnand %p2699_p3, %p2696_p2 }
  0x2a   :  { %2704 = shalt.err (!%p2701_p4)
}
  0x2b   :  { %s2705_s7 = scalar_lea.vmem %s46_s14, 32768  ;;  %p2710_p6 = scmp.lt.s32.totalorder %s46_s14, %s46_s14 }
  0x2c   :  { %p2706_p5 = scmp.ne.s32.totalorder %s46_s14, %s2705_s7  ;;  %p2711_p7 = scmp.lt.s32.totalorder %s2705_s7, %s2705_s7 }
  0x2e   :  { %p2712_p8 = por %p2711_p7, %p2710_p6 }
  0x30   :  { %p2713_p9 = pnand %p2712_p8, %p2706_p5 }
  0x32   :  { %2716 = shalt.err (!%p2713_p9)
}
  0x33   :  { %s2774_s0 = smov 512   ;;  %s2775_s8 = smov 32  }
  0x34   :  { %51 = dma.hbm_to_vmem [thread:$0]  %s2970_s3, 32768, %s46_s14, [#allocation6], %s2774_s0, %s2774_s0, %s2775_s8  }
  0x35   :  { %2761 = dma.done.wait [#allocation3], 32  }
  0x36   :  { %2762 = vsyncadd [#allocation3], 4294967264 }
  0x37   :  { %2763 = dma.done.wait [#allocation6], 34816  }
  0x38   :  { %2764 = vsyncadd [#allocation6], 4294932480  ;;  %v66_v0 = vlaneseq  ;;  %v2865_v3 = vld [vmem:[#allocation2] sm:$0x3]  ;;  %vm70_vm10 = vcmask 517120   ;;  %v2776_v15 = vmov 0  }
  0x39   :  { %v65_v4 = vmul.f32 %v2865_v3, %v2865_v3  ;;  %v2627_v13 = vld [vmem:[#allocation5 + $0x4] ss:$16 sps:$4 sm:$0xff]   ;;  %v2629_v14 = vld [vmem:[#allocation5 + $0xc] ss:$16 sps:$4 sm:$0xff]   ;;  %268 = vmatprep.mubr.bf16.mxu0 %v2776_v15  ;;  %309 = vmatprep.mubr.bf16.mxu1 %v2776_v15  ;;  %v2631_v16 = vld [vmem:[#allocation5] ss:$16 sps:$4 sm:$0xff]  }
  0x3a   :  { %v2853_v1 = vand.u32 127, %v66_v0  ;;  %236 = vmatprep.subr.bf16.mxu0 %v2627_v13  ;;  %277 = vmatprep.subr.bf16.mxu1 %v2629_v14  ;;  %v2632_v17 = vld [vmem:[#allocation5 + $0x8] ss:$16 sps:$4 sm:$0xff]   ;;  %v2633_v18 = vld [vmem:[#allocation5 + $0x24] ss:$16 sps:$4 sm:$0xff]   ;;  %v2777_v48 = vmov 0.0  }
  0x3b   :  { %237 = vmatpush1.bf16.msra.mxu0 %v2631_v16  ;;  %278 = vmatpush1.bf16.msra.mxu1 %v2632_v17  ;;  %v2635_v19 = vld [vmem:[#allocation5 + $0x2c] ss:$16 sps:$4 sm:$0xff]   ;;  %v2637_v20 = vld [vmem:[#allocation5 + $0x20] ss:$16 sps:$4 sm:$0xff]   ;;  %v2638_v21 = vld [vmem:[#allocation5 + $0x28] ss:$16 sps:$4 sm:$0xff]  }
  0x3c   :  { %vm84_vm0 = vcmp.ge.s32.totalorder %v2853_v1, 32  ;;  %vm85_vm1 = vcmp.lt.s32.totalorder %v2853_v1, 48  ;;  %vm74_vm2 = vcmp.ge.s32.totalorder %v2853_v1, 16  ;;  %vm75_vm4 = vcmp.lt.s32.totalorder %v2853_v1, 32  ;;  %238 = vmatprep.subr.bf16.mxu0 %v2633_v18  ;;  %279 = vmatprep.subr.bf16.mxu1 %v2635_v19  ;;  %v2639_v22 = vld [vmem:[#allocation5 + $0x44] ss:$16 sps:$4 sm:$0xff]  }
  0x3d   :  { %vm2858_vm3 = vmand %vm84_vm0, %vm85_vm1  ;;  %vm94_vm5 = vcmp.ge.s32.totalorder %v2853_v1, 48  ;;  %vm95_vm6 = vcmp.lt.s32.totalorder %v2853_v1, 64  ;;  %vm68_vm8 = vcmp.lt.s32.totalorder %v2853_v1, 16  ;;  %v2641_v23 = vld [vmem:[#allocation5 + $0x4c] ss:$16 sps:$4 sm:$0xff]   ;;  %v326_v30 = vld [vmem:[#allocation7] sm:$0xff] }
  0x3e   :  { %vm76_vm7 = vmand %vm74_vm2, %vm75_vm4  ;;  %v69_v5 = vsel %vm68_vm8, %v65_v4, 0.0  ;;  %v87_v6 = vsel %vm2858_vm3, %v65_v4, 0.0  ;;  %v2643_v24 = vld [vmem:[#allocation5 + $0x40] ss:$16 sps:$4 sm:$0xff]   ;;  %v2644_v25 = vld [vmem:[#allocation5 + $0x48] ss:$16 sps:$4 sm:$0xff]  }
  0x3f   :  { %vm96_vm9 = vmand %vm94_vm5, %vm95_vm6  ;;  %v77_v7 = vsel %vm76_vm7, %v65_v4, 0.0  ;;  %v71_v9 = vsel %vm70_vm10, %v69_v5, 0.0  ;;  %v88_v10 = vsel %vm70_vm10, %v87_v6, 0.0  ;;  %239 = vmatpush1.bf16.msra.mxu0 %v2637_v20  ;;  %280 = vmatpush1.bf16.msra.mxu1 %v2638_v21  ;;  %v2645_v26 = vld [vmem:[#allocation5 + $0x64] ss:$16 sps:$4 sm:$0xff]   ;;  %v327_v32 = vld [vmem:[#allocation7 + $0x8] sm:$0xff] }
  0x40   :  { %v97_v8 = vsel %vm96_vm9, %v65_v4, 0.0  ;;  %72 = vadd.xlane.f32.xlu0 %v71_v9  ;;  %89 = vadd.xlane.f32.xlu1 %v88_v10  ;;  %v78_v11 = vsel %vm70_vm10, %v77_v7, 0.0  ;;  %v2647_v27 = vld [vmem:[#allocation5 + $0x6c] ss:$16 sps:$4 sm:$0xff]   ;;  %v2649_v28 = vld [vmem:[#allocation5 + $0x60] ss:$16 sps:$4 sm:$0xff]  }
  0x41   :  { %v98_v12 = vsel %vm70_vm10, %v97_v8, 0.0  ;;  %240 = vmatprep.subr.bf16.mxu0 %v2639_v22  ;;  %281 = vmatprep.subr.bf16.mxu1 %v2641_v23  ;;  %v2650_v29 = vld [vmem:[#allocation5 + $0x68] ss:$16 sps:$4 sm:$0xff]   ;;  %v330_v31 = vld [vmem:[#allocation7 + $0x20] sm:$0xff]  ;;  %vm232_vm2 = vcmask 523264  }
  0x42   :  { %v2335_v33 = vcombine.low %v326_v30, %v330_v31  ;;  %v2336_v34 = vcombine.high %v326_v30, %v330_v31  ;;  %v331_v35 = vld [vmem:[#allocation7 + $0x28] sm:$0xff]  ;;  %v334_v51 = vld [vmem:[#allocation7 + $0x40] sm:$0xff] }
  0x43   :  { %241 = vmatpush1.bf16.msra.mxu0 %v2643_v24  ;;  %282 = vmatpush1.bf16.msra.mxu1 %v2644_v25  ;;  %v2337_v36 = vcombine.low %v327_v32, %v331_v35  ;;  %v2338_v37 = vcombine.high %v327_v32, %v331_v35  ;;  %v338_v52 = vld [vmem:[#allocation7 + $0x60] sm:$0xff]  ;;  %v335_v53 = vld [vmem:[#allocation7 + $0x48] sm:$0xff] }
  0x44   :  { %79 = vadd.xlane.f32.xlu0 %v78_v11  ;;  %99 = vadd.xlane.f32.xlu1 %v98_v12  ;;  %v339_v54 = vld [vmem:[#allocation7 + $0x68] sm:$0xff]  ;;  %v2344_v57 = vcombine.high %v334_v51, %v338_v52  ;;  %v342_v59 = vld [vmem:[#allocation7 + $0x80] sm:$0xff]  ;;  %v2343_v63 = vcombine.low %v334_v51, %v338_v52 }
  0x45   :  { %242 = vmatprep.subr.bf16.mxu0 %v2645_v26  ;;  %283 = vmatprep.subr.bf16.mxu1 %v2647_v27  ;;  %v2346_v58 = vcombine.high %v335_v53, %v339_v54  ;;  %v346_v60 = vld [vmem:[#allocation7 + $0xa0] sm:$0xff]  ;;  %v343_v61 = vld [vmem:[#allocation7 + $0x88] sm:$0xff] }
  0x46   :  { %v347_v62 = vld [vmem:[#allocation7 + $0xa8] sm:$0xff]  ;;  %v2352_v2 = vcombine.high %v342_v59, %v346_v60  ;;  %v350_v5 = vld [vmem:[#allocation7 + $0xc0] sm:$0xff]  ;;  %v2351_v8 = vcombine.low %v342_v59, %v346_v60 }
  0x47   :  { %243 = vmatpush1.bf16.msra.mxu0 %v2649_v28  ;;  %284 = vmatpush1.bf16.msra.mxu1 %v2650_v29  ;;  %v2354_v4 = vcombine.high %v343_v61, %v347_v62  ;;  %v351_v6 = vld [vmem:[#allocation7 + $0xc8] sm:$0xff]  ;;  %v2353_v9 = vcombine.low %v343_v61, %v347_v62  ;;  %v358_v12 = vld [vmem:[#allocation7 + $0x100] sm:$0xff] }
  0x48   :  { %1904 = vmatprep.subr.bf16.mxu0 %v2336_v34  ;;  %1986 = vmatprep.subr.bf16.mxu1 %v2338_v37  ;;  %v355_v7 = vld [vmem:[#allocation7 + $0xe8] sm:$0xff]  ;;  %v362_v13 = vld [vmem:[#allocation7 + $0x120] sm:$0xff] }
  0x49   :  { %v2362_v11 = vcombine.high %v351_v6, %v355_v7  ;;  %v359_v14 = vld [vmem:[#allocation7 + $0x108] sm:$0xff]  ;;  %v2361_v17 = vcombine.low %v351_v6, %v355_v7  ;;  %v2368_v18 = vcombine.high %v358_v12, %v362_v13  ;;  %v366_v20 = vld [vmem:[#allocation7 + $0x140] sm:$0xff]  ;;  %v2367_v24 = vcombine.low %v358_v12, %v362_v13 }
  0x4a   :  { %v370_v21 = vld [vmem:[#allocation7 + $0x160] sm:$0xff]  ;;  %v367_v22 = vld [vmem:[#allocation7 + $0x148] sm:$0xff] }
  0x4b   :  { %v371_v23 = vld [vmem:[#allocation7 + $0x168] sm:$0xff]  ;;  %v2376_v26 = vcombine.high %v366_v20, %v370_v21  ;;  %v374_v28 = vld [vmem:[#allocation7 + $0x180] sm:$0xff]  ;;  %v2375_v32 = vcombine.low %v366_v20, %v370_v21 }
  0x4c   :  { %v2378_v27 = vcombine.high %v367_v22, %v371_v23  ;;  %v378_v29 = vld [vmem:[#allocation7 + $0x1a0] sm:$0xff]  ;;  %v375_v30 = vld [vmem:[#allocation7 + $0x188] sm:$0xff] }
  0x4d   :  { %v379_v31 = vld [vmem:[#allocation7 + $0x1a8] sm:$0xff]  ;;  %v2384_v34 = vcombine.high %v374_v28, %v378_v29  ;;  %v386_v37 = vld [vmem:[#allocation7 + $0x1e0] sm:$0xff] }
  0x4e   :  { %v2386_v35 = vcombine.high %v375_v30, %v379_v31  ;;  %v398_v52 = vld [vmem:[#allocation7 + $0x240] sm:$0xff]  ;;  %v407_v62 = vld [vmem:[#allocation7 + $0x288] sm:$0xff] }
  0x4f   :  { %v406_v60 = vld [vmem:[#allocation7 + $0x280] sm:$0xff]  ;;  %v415_v7 = vld [vmem:[#allocation7 + $0x2c8] sm:$0xff] }
  0x50   :  { %v410_v61 = vld [vmem:[#allocation7 + $0x2a0] sm:$0xff] }
  0x51   :  { %v418_v6 = vld [vmem:[#allocation7 + $0x2e0] sm:$0xff] }
  0x52   :  { %v422_v13 = vld [vmem:[#allocation7 + $0x300] sm:$0xff] }
  0x53   :  { %v430_v21 = vld [vmem:[#allocation7 + $0x340] sm:$0xff] }
  0xcd   :  { %v73_v38 = vpop.xlane.xlu0 %72  ;;  %v90_v39 = vpop.xlane.xlu1 %89 }
  0xd1   :  { %v80_v40 = vpop.xlane.xlu0 %79  ;;  %v100_v43 = vpop.xlane.xlu1 %99 }
  0xd2   :  { %vm81_vm11 = vcmp.gt.f32.partialorder %v80_v40, %v73_v38 }
  0xd3   :  { %v82_v41 = vsel %vm81_vm11, 1, %v2776_v15  ;;  %v83_v42 = vsel %vm81_vm11, %v80_v40, %v73_v38  ;;  %v363_v15 = vld [vmem:[#allocation7 + $0x128] sm:$0xff]  ;;  %v2383_v40 = vcombine.low %v374_v28, %v378_v29 }
  0xd4   :  { %vm91_vm12 = vcmp.gt.f32.partialorder %v90_v39, %v83_v42  ;;  %v2370_v19 = vcombine.high %v359_v14, %v363_v15  ;;  %v2369_v25 = vcombine.low %v359_v14, %v363_v15  ;;  %v383_v38 = vld [vmem:[#allocation7 + $0x1c8] sm:$0xff]  ;;  %v426_v14 = vld [vmem:[#allocation7 + $0x320] sm:$0xff] }
  0xd5   :  { %v92_v44 = vsel %vm91_vm12, 2, %v82_v41  ;;  %v93_v45 = vsel %vm91_vm12, %v90_v39, %v83_v42  ;;  %v387_v39 = vld [vmem:[#allocation7 + $0x1e8] sm:$0xff]  ;;  %v2385_v41 = vcombine.low %v375_v30, %v379_v31  ;;  %v438_v31 = vld [vmem:[#allocation7 + $0x380] sm:$0xff] }
  0xd6   :  { %vm101_vm13 = vcmp.gt.f32.partialorder %v100_v43, %v93_v45  ;;  %v2394_v43 = vcombine.high %v383_v38, %v387_v39  ;;  %v394_v45 = vld [vmem:[#allocation7 + $0x220] sm:$0xff]  ;;  %v423_v15 = vld [vmem:[#allocation7 + $0x308] sm:$0xff] }
  0xd7   :  { %v102_v46 = vsel %vm101_vm13, 3, %v92_v44  ;;  %v390_v44 = vld [vmem:[#allocation7 + $0x200] sm:$0xff] }
  0xd8   :  { %vm103_vm14 = vcmp.eq.s32.totalorder %v2853_v1, %v102_v46  ;;  %v107_v47 = vmul.u32 16, %v102_v46  ;;  %v391_v46 = vld [vmem:[#allocation7 + $0x208] sm:$0xff] }
  0xd9   :  { %v2316_v49 = vsel %vm103_vm14, 1.0, %v2777_v48 }
  0xda   :  { %v109_v50 = vadd.s32 16, %v107_v47  ;;  %106 = vst [vmem:[#allocation8] sm:$0x3] %v2316_v49  ;;  %vm108_vm15 = vcmp.ge.s32.totalorder %v2853_v1, %v107_v47  ;;  %v395_v47 = vld [vmem:[#allocation7 + $0x228] sm:$0xff]  ;;  %v2393_v49 = vcombine.low %v383_v38, %v387_v39  ;;  %v446_v39 = vld [vmem:[#allocation7 + $0x3c0] sm:$0xff] }
  0xdb   :  { %v2402_v51 = vcombine.high %v391_v46, %v395_v47 }
  0xdc   :  { %vm110_vm0 = vcmp.lt.s32.totalorder %v2853_v1, %v109_v50  ;;  %v2345_v1 = vcombine.low %v335_v53, %v339_v54  ;;  %v2400_v50 = vcombine.high %v390_v44, %v394_v45  ;;  %v402_v53 = vld [vmem:[#allocation7 + $0x260] sm:$0xff]  ;;  %v399_v54 = vld [vmem:[#allocation7 + $0x248] sm:$0xff] }
  0xdd   :  { %vm111_vm1 = vmand %vm108_vm15, %vm110_vm0 }
  0xde   :  { %v112_v55 = vsel %vm111_vm1, %v2865_v3, 0.0  ;;  %v354_v3 = vld [vmem:[#allocation7 + $0xe0] sm:$0xff] }
  0xdf   :  { %v113_v56 = vpack.c.bf16 %v112_v55, %v112_v55  ;;  %v2360_v10 = vcombine.high %v350_v5, %v354_v3  ;;  %v2359_v16 = vcombine.low %v350_v5, %v354_v3  ;;  %v403_v55 = vld [vmem:[#allocation7 + $0x268] sm:$0xff]  ;;  %v414_v3 = vld [vmem:[#allocation7 + $0x2c0] sm:$0xff] }
  0xe0   :  { %v2410_v59 = vcombine.high %v399_v54, %v403_v55 }
  0xe1   :  { %2333 = vmatmul.mubr.msk.bf16.vlgmr.msra.gmra.mrb[0].mxu0 %vm232_vm2, %v113_v56  ;;  %2334 = vmatmul.mubr.msk.bf16.vlgmr.msra.gmra.mrb[0].mxu1 %vm232_vm2, %v113_v56  ;;  %v2399_v56 = vcombine.low %v390_v44, %v394_v45 }
  0xe2   :  { %1905 = vmatpush1.bf16.msra.mxu0 %v2335_v33  ;;  %1987 = vmatpush1.bf16.msra.mxu1 %v2337_v36  ;;  %v2377_v33 = vcombine.low %v367_v22, %v371_v23  ;;  %v382_v36 = vld [vmem:[#allocation7 + $0x1c0] sm:$0xff]  ;;  %v431_v23 = vld [vmem:[#allocation7 + $0x348] sm:$0xff] }
  0xe3   :  { %1906 = vmatprep.subr.bf16.mxu0 %v2344_v57  ;;  %1988 = vmatprep.subr.bf16.mxu1 %v2346_v58  ;;  %v2392_v42 = vcombine.high %v382_v36, %v386_v37  ;;  %v2391_v48 = vcombine.low %v382_v36, %v386_v37  ;;  %v2401_v57 = vcombine.low %v391_v46, %v395_v47  ;;  %v434_v22 = vld [vmem:[#allocation7 + $0x360] sm:$0xff] }
  0xe4   :  { %v2408_v58 = vcombine.high %v398_v52, %v402_v53  ;;  %v2439_v29 = vcombine.low %v430_v21, %v434_v22  ;;  %v454_v47 = vld [vmem:[#allocation7 + $0x400] sm:$0xff] }
  0xe6   :  { %1907 = vmatpush1.bf16.msra.mxu0 %v2343_v63  ;;  %1989 = vmatpush1.bf16.msra.mxu1 %v2345_v1  ;;  %v411_v63 = vld [vmem:[#allocation7 + $0x2a8] sm:$0xff]  ;;  %v2407_v1 = vcombine.low %v398_v52, %v402_v53 }
  0xe7   :  { %1908 = vmatprep.subr.bf16.mxu0 %v2352_v2  ;;  %1990 = vmatprep.subr.bf16.mxu1 %v2354_v4  ;;  %v2409_v2 = vcombine.low %v399_v54, %v403_v55  ;;  %v2416_v4 = vcombine.high %v406_v60, %v410_v61  ;;  %v2418_v5 = vcombine.high %v407_v62, %v411_v63  ;;  %v2877_v55 = vshrl.u32 %v66_v0, 7 }
  0xea   :  { %1909 = vmatpush1.bf16.msra.mxu0 %v2351_v8  ;;  %1991 = vmatpush1.bf16.msra.mxu1 %v2353_v9  ;;  %v419_v8 = vld [vmem:[#allocation7 + $0x2e8] sm:$0xff]  ;;  %v2415_v9 = vcombine.low %v406_v60, %v410_v61 }
  0xeb   :  { %1910 = vmatprep.subr.bf16.mxu0 %v2360_v10  ;;  %1992 = vmatprep.subr.bf16.mxu1 %v2362_v11  ;;  %v2417_v10 = vcombine.low %v407_v62, %v411_v63  ;;  %v2424_v11 = vcombine.high %v414_v3, %v418_v6  ;;  %v2426_v12 = vcombine.high %v415_v7, %v419_v8 }
  0xee   :  { %1911 = vmatpush1.bf16.msra.mxu0 %v2359_v16  ;;  %1993 = vmatpush1.bf16.msra.mxu1 %v2361_v17  ;;  %v427_v16 = vld [vmem:[#allocation7 + $0x328] sm:$0xff]  ;;  %v2423_v17 = vcombine.low %v414_v3, %v418_v6 }
  0xef   :  { %1912 = vmatprep.subr.bf16.mxu0 %v2368_v18  ;;  %1994 = vmatprep.subr.bf16.mxu1 %v2370_v19  ;;  %v2425_v18 = vcombine.low %v415_v7, %v419_v8  ;;  %v2432_v19 = vcombine.high %v422_v13, %v426_v14  ;;  %v2434_v20 = vcombine.high %v423_v15, %v427_v16 }
  0xf2   :  { %1913 = vmatpush1.bf16.msra.mxu0 %v2367_v24  ;;  %1995 = vmatpush1.bf16.msra.mxu1 %v2369_v25  ;;  %v435_v24 = vld [vmem:[#allocation7 + $0x368] sm:$0xff]  ;;  %v2431_v25 = vcombine.low %v422_v13, %v426_v14  ;;  %v466_v14 = vld [vmem:[#allocation7 + $0x460] sm:$0xff] }
  0xf3   :  { %1914 = vmatprep.subr.bf16.mxu0 %v2376_v26  ;;  %1996 = vmatprep.subr.bf16.mxu1 %v2378_v27  ;;  %v2433_v26 = vcombine.low %v423_v15, %v427_v16  ;;  %v2440_v27 = vcombine.high %v430_v21, %v434_v22  ;;  %v2442_v28 = vcombine.high %v431_v23, %v435_v24  ;;  %v463_v15 = vld [vmem:[#allocation7 + $0x448] sm:$0xff]  ;;  %v474_v22 = vld [vmem:[#allocation7 + $0x4a0] sm:$0xff] }
  0xf4   :  { %v2441_v30 = vcombine.low %v431_v23, %v435_v24  ;;  %v467_v16 = vld [vmem:[#allocation7 + $0x468] sm:$0xff] }
  0xf5   :  { %v2474_v21 = vcombine.high %v463_v15, %v467_v16  ;;  %v471_v23 = vld [vmem:[#allocation7 + $0x488] sm:$0xff] }
  0xf6   :  { %1915 = vmatpush1.bf16.msra.mxu0 %v2375_v32  ;;  %1997 = vmatpush1.bf16.msra.mxu1 %v2377_v33  ;;  %v442_v32 = vld [vmem:[#allocation7 + $0x3a0] sm:$0xff]  ;;  %v439_v33 = vld [vmem:[#allocation7 + $0x388] sm:$0xff] }
  0xf7   :  { %1916 = vmatprep.subr.bf16.mxu0 %v2384_v34  ;;  %1998 = vmatprep.subr.bf16.mxu1 %v2386_v35  ;;  %v2448_v34 = vcombine.high %v438_v31, %v442_v32  ;;  %v443_v35 = vld [vmem:[#allocation7 + $0x3a8] sm:$0xff]  ;;  %v2447_v36 = vcombine.low %v438_v31, %v442_v32  ;;  %v482_v31 = vld [vmem:[#allocation7 + $0x4e0] sm:$0xff] }
  0xf8   :  { %v2449_v37 = vcombine.low %v439_v33, %v443_v35  ;;  %v2450_v38 = vcombine.high %v439_v33, %v443_v35  ;;  %v475_v24 = vld [vmem:[#allocation7 + $0x4a8] sm:$0xff] }
  0xf9   :  { %v479_v32 = vld [vmem:[#allocation7 + $0x4c8] sm:$0xff]  ;;  %v2481_v35 = vcombine.low %v471_v23, %v475_v24 }
  0xfa   :  { %1917 = vmatpush1.bf16.msra.mxu0 %v2383_v40  ;;  %1999 = vmatpush1.bf16.msra.mxu1 %v2385_v41  ;;  %v450_v40 = vld [vmem:[#allocation7 + $0x3e0] sm:$0xff]  ;;  %v447_v41 = vld [vmem:[#allocation7 + $0x3c8] sm:$0xff] }
  0xfb   :  { %1918 = vmatprep.subr.bf16.mxu0 %v2392_v42  ;;  %2000 = vmatprep.subr.bf16.mxu1 %v2394_v43  ;;  %v2456_v42 = vcombine.high %v446_v39, %v450_v40  ;;  %v451_v43 = vld [vmem:[#allocation7 + $0x3e8] sm:$0xff]  ;;  %v2455_v44 = vcombine.low %v446_v39, %v450_v40  ;;  %v490_v39 = vld [vmem:[#allocation7 + $0x520] sm:$0xff] }
  0xfc   :  { %v2457_v45 = vcombine.low %v447_v41, %v451_v43  ;;  %v2458_v46 = vcombine.high %v447_v41, %v451_v43  ;;  %v483_v33 = vld [vmem:[#allocation7 + $0x4e8] sm:$0xff] }
  0xfd   :  { %v487_v40 = vld [vmem:[#allocation7 + $0x508] sm:$0xff]  ;;  %v2489_v43 = vcombine.low %v479_v32, %v483_v33 }
  0xfe   :  { %1919 = vmatpush1.bf16.msra.mxu0 %v2391_v48  ;;  %2001 = vmatpush1.bf16.msra.mxu1 %v2393_v49  ;;  %v458_v48 = vld [vmem:[#allocation7 + $0x420] sm:$0xff]  ;;  %v455_v49 = vld [vmem:[#allocation7 + $0x408] sm:$0xff] }
  0xff   :  { %1920 = vmatprep.subr.bf16.mxu0 %v2400_v50  ;;  %2002 = vmatprep.subr.bf16.mxu1 %v2402_v51  ;;  %v2464_v50 = vcombine.high %v454_v47, %v458_v48  ;;  %v459_v51 = vld [vmem:[#allocation7 + $0x428] sm:$0xff]  ;;  %v2463_v52 = vcombine.low %v454_v47, %v458_v48  ;;  %v498_v47 = vld [vmem:[#allocation7 + $0x560] sm:$0xff] }
 0x100   :  { %v2465_v53 = vcombine.low %v455_v49, %v459_v51  ;;  %v2466_v54 = vcombine.high %v455_v49, %v459_v51  ;;  %v491_v41 = vld [vmem:[#allocation7 + $0x528] sm:$0xff] }
 0x101   :  { %v495_v48 = vld [vmem:[#allocation7 + $0x548] sm:$0xff]  ;;  %v2497_v51 = vcombine.low %v487_v40, %v491_v41 }
 0x102   :  { %1921 = vmatpush1.bf16.msra.mxu0 %v2399_v56  ;;  %2003 = vmatpush1.bf16.msra.mxu1 %v2401_v57  ;;  %v134_v56 = vsub.s32 0, %v2877_v55  ;;  %v2883_v57 = vld [vmem:[%s2969_s2] sm:$0xf] }
 0x103   :  { %1922 = vmatprep.subr.bf16.mxu0 %v2408_v58  ;;  %2004 = vmatprep.subr.bf16.mxu1 %v2410_v59  ;;  %v138_v58 = vsub.s32 1, %v2877_v55  ;;  %v146_v59 = vsub.s32 3, %v2877_v55  ;;  %v499_v49 = vld [vmem:[#allocation7 + $0x568] sm:$0xff] }
 0x104   :  { %v135_v60 = vrot.slane %v2883_v57, %v134_v56 }
 0x105   :  { %v139_v0 = vrot.slane %v2883_v57, %v138_v58  ;;  %v147_v61 = vrot.slane %v2883_v57, %v146_v59 }
 0x106   :  { %1923 = vmatpush1.bf16.msra.mxu0 %v2407_v1  ;;  %2005 = vmatpush1.bf16.msra.mxu1 %v2409_v2 }
 0x107   :  { %1924 = vmatprep.subr.bf16.mxu0 %v2416_v4  ;;  %2006 = vmatprep.subr.bf16.mxu1 %v2418_v5 }
 0x10a   :  { %1925 = vmatpush1.bf16.msra.mxu0 %v2415_v9  ;;  %2007 = vmatpush1.bf16.msra.mxu1 %v2417_v10 }
 0x10b   :  { %1926 = vmatprep.subr.bf16.mxu0 %v2424_v11  ;;  %2008 = vmatprep.subr.bf16.mxu1 %v2426_v12  ;;  %v462_v12 = vld [vmem:[#allocation7 + $0x440] sm:$0xff] }
 0x10e   :  { %1927 = vmatpush1.bf16.msra.mxu0 %v2423_v17  ;;  %2009 = vmatpush1.bf16.msra.mxu1 %v2425_v18 }
 0x10f   :  { %1928 = vmatprep.subr.bf16.mxu0 %v2432_v19  ;;  %2010 = vmatprep.subr.bf16.mxu1 %v2434_v20  ;;  %v470_v19 = vld [vmem:[#allocation7 + $0x480] sm:$0xff]  ;;  %v2472_v20 = vcombine.high %v462_v12, %v466_v14 }
 0x112   :  { %1929 = vmatpush1.bf16.msra.mxu0 %v2431_v25  ;;  %2011 = vmatpush1.bf16.msra.mxu1 %v2433_v26  ;;  %v2471_v26 = vcombine.low %v462_v12, %v466_v14  ;;  %v518_v12 = vld [vmem:[#allocation7 + $0x600] sm:$0xff]  ;;  %v519_v14 = vld [vmem:[#allocation7 + $0x608] sm:$0xff] }
 0x113   :  { %1930 = vmatprep.subr.bf16.mxu0 %v2440_v27  ;;  %2012 = vmatprep.subr.bf16.mxu1 %v2442_v28  ;;  %v2473_v27 = vcombine.low %v463_v15, %v467_v16  ;;  %v2480_v28 = vcombine.high %v470_v19, %v474_v22  ;;  %v523_v15 = vld [vmem:[#allocation7 + $0x628] sm:$0xff] }
 0x116   :  { %1931 = vmatpush1.bf16.msra.mxu0 %v2439_v29  ;;  %2013 = vmatpush1.bf16.msra.mxu1 %v2441_v30  ;;  %v2482_v29 = vcombine.high %v471_v23, %v475_v24  ;;  %v478_v30 = vld [vmem:[#allocation7 + $0x4c0] sm:$0xff]  ;;  %v527_v24 = vld [vmem:[#allocation7 + $0x648] sm:$0xff] }
 0x117   :  { %1932 = vmatprep.subr.bf16.mxu0 %v2448_v34  ;;  %2014 = vmatprep.subr.bf16.mxu1 %v2450_v38  ;;  %v2479_v34 = vcombine.low %v470_v19, %v474_v22  ;;  %v486_v38 = vld [vmem:[#allocation7 + $0x500] sm:$0xff] }
 0x118   :  { %v526_v22 = vld [vmem:[#allocation7 + $0x640] sm:$0xff] }
 0x119   :  { %v530_v23 = vld [vmem:[#allocation7 + $0x660] sm:$0xff] }
 0x11a   :  { %1933 = vmatpush1.bf16.msra.mxu0 %v2447_v36  ;;  %2015 = vmatpush1.bf16.msra.mxu1 %v2449_v37  ;;  %v2488_v36 = vcombine.high %v478_v30, %v482_v31  ;;  %v2490_v37 = vcombine.high %v479_v32, %v483_v33  ;;  %v538_v32 = vld [vmem:[#allocation7 + $0x6a0] sm:$0xff]  ;;  %v535_v33 = vld [vmem:[#allocation7 + $0x688] sm:$0xff] }
 0x11b   :  { %1934 = vmatprep.subr.bf16.mxu0 %v2456_v42  ;;  %2016 = vmatprep.subr.bf16.mxu1 %v2458_v46  ;;  %v2487_v42 = vcombine.low %v478_v30, %v482_v31  ;;  %v494_v46 = vld [vmem:[#allocation7 + $0x540] sm:$0xff] }
 0x11c   :  { %v534_v31 = vld [vmem:[#allocation7 + $0x680] sm:$0xff] }
 0x11e   :  { %1935 = vmatpush1.bf16.msra.mxu0 %v2455_v44  ;;  %2017 = vmatpush1.bf16.msra.mxu1 %v2457_v45  ;;  %v2496_v44 = vcombine.high %v486_v38, %v490_v39  ;;  %v2498_v45 = vcombine.high %v487_v40, %v491_v41  ;;  %v546_v40 = vld [vmem:[#allocation7 + $0x6e0] sm:$0xff]  ;;  %v543_v41 = vld [vmem:[#allocation7 + $0x6c8] sm:$0xff] }
 0x11f   :  { %1945 = vmatprep.subr.bf16.mxu0 %v2464_v50  ;;  %2027 = vmatprep.subr.bf16.mxu1 %v2466_v54  ;;  %v2495_v50 = vcombine.low %v486_v38, %v490_v39  ;;  %v502_v54 = vld [vmem:[#allocation7 + $0x580] sm:$0xff] }
 0x120   :  { %v542_v39 = vld [vmem:[#allocation7 + $0x6c0] sm:$0xff] }
 0x1b4   :  { %v270_v62 = vpop.f32.mrb[0].mxu0  ;;  %v2896_v63 = vpop.f32.mrb[0].mxu1 }
 0x1b5   :  { %v271_v1 = vadd.f32 %v270_v62, %v135_v60  ;;  %v272_v2 = vpop.f32.mrb[1].mxu0  ;;  %v313_v4 = vpop.f32.mrb[1].mxu1  ;;  %v506_v60 = vld [vmem:[#allocation7 + $0x5a0] sm:$0xff]  ;;  %v2503_v62 = vcombine.low %v494_v46, %v498_v47 }
 0x1b6   :  { %v273_v5 = vadd.f32 %v272_v2, %v139_v0  ;;  %v314_v3 = vadd.f32 %v313_v4, %v147_v61  ;;  %v274_v6 = vpop.f32.mrb[2].mxu0  ;;  %v315_v7 = vpop.f32.mrb[2].mxu1  ;;  %v503_v0 = vld [vmem:[#allocation7 + $0x588] sm:$0xff]  ;;  %v2512_v2 = vcombine.high %v502_v54, %v506_v60 }
 0x1b7   :  { %v318_v8 = vmax.f32 %v271_v1, 0.0  ;;  %v275_v9 = vpop.f32.mrb[3].mxu0  ;;  %v316_v10 = vpop.f32.mrb[3].mxu1  ;;  %v507_v61 = vld [vmem:[#allocation7 + $0x5a8] sm:$0xff]  ;;  %v2505_v1 = vcombine.low %v495_v48, %v499_v49 }
 0x1b8   :  { %v319_v11 = vmax.f32 %v273_v5, 0.0  ;;  %v321_v13 = vmax.f32 %v314_v3, 0.0  ;;  %v2514_v4 = vcombine.high %v503_v0, %v507_v61  ;;  %v510_v5 = vld [vmem:[#allocation7 + $0x5c0] sm:$0xff]  ;;  %v511_v6 = vld [vmem:[#allocation7 + $0x5c8] sm:$0xff]  ;;  %v2513_v9 = vcombine.low %v503_v0, %v507_v61 }
 0x1b9   :  { %v2900_v18 = vpack.c.bf16 %v318_v8, %v318_v8  ;;  %v514_v3 = vld [vmem:[#allocation7 + $0x5e0] sm:$0xff]  ;;  %v515_v7 = vld [vmem:[#allocation7 + $0x5e8] sm:$0xff]  ;;  %v2511_v8 = vcombine.low %v502_v54, %v506_v60 }
 0x1ba   :  { %v2898_v17 = vpack.c.bf16 %v319_v11, %v319_v11  ;;  %v2904_v25 = vpack.c.bf16 %v321_v13, %v321_v13  ;;  %v2520_v10 = vcombine.high %v510_v5, %v514_v3  ;;  %v2522_v11 = vcombine.high %v511_v6, %v515_v7  ;;  %v522_v13 = vld [vmem:[#allocation7 + $0x620] sm:$0xff]  ;;  %v559_v61 = vld [vmem:[#allocation7 + $0x748] sm:$0xff] }
 0x1bb   :  { %v2519_v16 = vcombine.low %v510_v5, %v514_v3  ;;  %v2521_v19 = vcombine.low %v511_v6, %v515_v7  ;;  %v558_v60 = vld [vmem:[#allocation7 + $0x740] sm:$0xff] }
 0x1bc   :  { %1936 = vmatprep.mubr.bf16.mxu0 %v2898_v17  ;;  %2018 = vmatprep.mubr.bf16.mxu1 %v2898_v17  ;;  %v562_v0 = vld [vmem:[#allocation7 + $0x760] sm:$0xff] }
 0x1bd   :  { %1937 = vmatmul.mubr.bf16.vlgmr.msra.gmra.mrb[4].mxu0 %v2900_v18  ;;  %2019 = vmatmul.mubr.bf16.vlgmr.msra.gmra.mrb[4].mxu1 %v2900_v18  ;;  %v2568_v5 = vcombine.high %v558_v60, %v562_v0  ;;  %v566_v6 = vld [vmem:[#allocation7 + $0x780] sm:$0xff] }
 0x1be   :  { %1946 = vmatpush1.bf16.msra.mxu0 %v2463_v52  ;;  %2028 = vmatpush1.bf16.msra.mxu1 %v2465_v53  ;;  %v2504_v52 = vcombine.high %v494_v46, %v498_v47  ;;  %v2506_v53 = vcombine.high %v495_v48, %v499_v49  ;;  %v550_v47 = vld [vmem:[#allocation7 + $0x700] sm:$0xff]  ;;  %v551_v49 = vld [vmem:[#allocation7 + $0x708] sm:$0xff] }
 0x1bf   :  { %1977 = vmatprep.mubr.bf16.mxu0 %v2904_v25  ;;  %2059 = vmatprep.mubr.bf16.mxu1 %v2904_v25  ;;  %v554_v48 = vld [vmem:[#allocation7 + $0x720] sm:$0xff] }
 0x1c0   :  { %1947 = vmatprep.subr.bf16.mxu0 %v2472_v20  ;;  %2029 = vmatprep.subr.bf16.mxu1 %v2474_v21  ;;  %v2528_v20 = vcombine.high %v518_v12, %v522_v13  ;;  %v2530_v21 = vcombine.high %v519_v14, %v523_v15  ;;  %v570_v7 = vld [vmem:[#allocation7 + $0x7a0] sm:$0xff] }
 0x1c2   :  { %1948 = vmatpush1.bf16.msra.mxu0 %v2471_v26  ;;  %2030 = vmatpush1.bf16.msra.mxu1 %v2473_v27  ;;  %v531_v26 = vld [vmem:[#allocation7 + $0x668] sm:$0xff]  ;;  %v2527_v27 = vcombine.low %v518_v12, %v522_v13  ;;  %v2576_v13 = vcombine.high %v566_v6, %v570_v7 }
 0x1c3   :  { %1949 = vmatprep.subr.bf16.mxu0 %v2480_v28  ;;  %2031 = vmatprep.subr.bf16.mxu1 %v2482_v29  ;;  %v2529_v28 = vcombine.low %v519_v14, %v523_v15  ;;  %v2536_v29 = vcombine.high %v526_v22, %v530_v23  ;;  %v2538_v30 = vcombine.high %v527_v24, %v531_v26  ;;  %v574_v15 = vld [vmem:[#allocation7 + $0x7c0] sm:$0xff] }
 0x1c6   :  { %1950 = vmatpush1.bf16.msra.mxu0 %v2479_v34  ;;  %2032 = vmatpush1.bf16.msra.mxu1 %v2481_v35  ;;  %v539_v34 = vld [vmem:[#allocation7 + $0x6a8] sm:$0xff]  ;;  %v2535_v35 = vcombine.low %v526_v22, %v530_v23 }
 0x1c7   :  { %1951 = vmatprep.subr.bf16.mxu0 %v2488_v36  ;;  %2033 = vmatprep.subr.bf16.mxu1 %v2490_v37  ;;  %v2537_v36 = vcombine.low %v527_v24, %v531_v26  ;;  %v2544_v37 = vcombine.high %v534_v31, %v538_v32  ;;  %v2546_v38 = vcombine.high %v535_v33, %v539_v34 }
 0x1ca   :  { %1952 = vmatpush1.bf16.msra.mxu0 %v2487_v42  ;;  %2034 = vmatpush1.bf16.msra.mxu1 %v2489_v43  ;;  %v547_v42 = vld [vmem:[#allocation7 + $0x6e8] sm:$0xff]  ;;  %v2543_v43 = vcombine.low %v534_v31, %v538_v32 }
 0x1cb   :  { %1953 = vmatprep.subr.bf16.mxu0 %v2496_v44  ;;  %2035 = vmatprep.subr.bf16.mxu1 %v2498_v45  ;;  %v2545_v44 = vcombine.low %v535_v33, %v539_v34  ;;  %v2552_v45 = vcombine.high %v542_v39, %v546_v40  ;;  %v2554_v46 = vcombine.high %v543_v41, %v547_v42 }
 0x1ce   :  { %1954 = vmatpush1.bf16.msra.mxu0 %v2495_v50  ;;  %2036 = vmatpush1.bf16.msra.mxu1 %v2497_v51  ;;  %v555_v50 = vld [vmem:[#allocation7 + $0x728] sm:$0xff]  ;;  %v2551_v51 = vcombine.low %v542_v39, %v546_v40 }
 0x1cf   :  { %1955 = vmatprep.subr.bf16.mxu0 %v2504_v52  ;;  %2037 = vmatprep.subr.bf16.mxu1 %v2506_v53  ;;  %v2553_v52 = vcombine.low %v543_v41, %v547_v42  ;;  %v2560_v53 = vcombine.high %v550_v47, %v554_v48  ;;  %v2562_v54 = vcombine.high %v551_v49, %v555_v50 }
 0x1d2   :  { %1956 = vmatpush1.bf16.msra.mxu0 %v2503_v62  ;;  %2038 = vmatpush1.bf16.msra.mxu1 %v2505_v1  ;;  %v563_v62 = vld [vmem:[#allocation7 + $0x768] sm:$0xff]  ;;  %v2559_v1 = vcombine.low %v550_v47, %v554_v48 }
 0x1d3   :  { %1957 = vmatprep.subr.bf16.mxu0 %v2512_v2  ;;  %2039 = vmatprep.subr.bf16.mxu1 %v2514_v4  ;;  %v2561_v2 = vcombine.low %v551_v49, %v555_v50  ;;  %v142_v4 = vsub.s32 2, %v2877_v55  ;;  %v2570_v3 = vcombine.high %v559_v61, %v563_v62 }
 0x1d5   :  { %v143_v12 = vrot.slane %v2883_v57, %v142_v4  ;;  %v332_v57 = vld [vmem:[#allocation7 + $0x30] sm:$0xff] }
 0x1d6   :  { %1958 = vmatpush1.bf16.msra.mxu0 %v2511_v8  ;;  %2040 = vmatpush1.bf16.msra.mxu1 %v2513_v9  ;;  %v567_v8 = vld [vmem:[#allocation7 + $0x788] sm:$0xff] }
 0x1d7   :  { %1959 = vmatprep.subr.bf16.mxu0 %v2520_v10  ;;  %2041 = vmatprep.subr.bf16.mxu1 %v2522_v11  ;;  %v571_v9 = vld [vmem:[#allocation7 + $0x7a8] sm:$0xff]  ;;  %v2567_v10 = vcombine.low %v558_v60, %v562_v0  ;;  %v2569_v11 = vcombine.low %v559_v61, %v563_v62  ;;  %v312_v23 = vadd.f32 %v2896_v63, %v143_v12  ;;  %v337_v63 = vld [vmem:[#allocation7 + $0x58] sm:$0xff] }
 0x1d8   :  { %v2578_v14 = vcombine.high %v567_v8, %v571_v9  ;;  %v2577_v22 = vcombine.low %v567_v8, %v571_v9  ;;  %v368_v9 = vld [vmem:[#allocation7 + $0x150] sm:$0xff]  ;;  %v373_v12 = vld [vmem:[#allocation7 + $0x178] sm:$0xff] }
 0x1d9   :  { %v320_v32 = vmax.f32 %v312_v23, 0.0 }
 0x1da   :  { %1960 = vmatpush1.bf16.msra.mxu0 %v2519_v16  ;;  %2042 = vmatpush1.bf16.msra.mxu1 %v2521_v19  ;;  %v578_v16 = vld [vmem:[#allocation7 + $0x7e0] sm:$0xff]  ;;  %v575_v19 = vld [vmem:[#allocation7 + $0x7c8] sm:$0xff] }
 0x1db   :  { %1961 = vmatprep.subr.bf16.mxu0 %v2528_v20  ;;  %2043 = vmatprep.subr.bf16.mxu1 %v2530_v21  ;;  %v579_v20 = vld [vmem:[#allocation7 + $0x7e8] sm:$0xff]  ;;  %v2575_v21 = vcombine.low %v566_v6, %v570_v7  ;;  %v2584_v24 = vcombine.high %v574_v15, %v578_v16  ;;  %v2915_v39 = vpack.c.bf16 %v320_v32, %v320_v32 }
 0x1dc   :  { %v2586_v26 = vcombine.high %v575_v19, %v579_v20  ;;  %v2585_v31 = vcombine.low %v575_v19, %v579_v20  ;;  %v376_v19 = vld [vmem:[#allocation7 + $0x190] sm:$0xff] }
 0x1dd   :  { %v380_v20 = vld [vmem:[#allocation7 + $0x1b0] sm:$0xff] }
 0x1de   :  { %1962 = vmatpush1.bf16.msra.mxu0 %v2527_v27  ;;  %2044 = vmatpush1.bf16.msra.mxu1 %v2529_v28  ;;  %v328_v27 = vld [vmem:[#allocation7 + $0x10] sm:$0xff]  ;;  %v329_v28 = vld [vmem:[#allocation7 + $0x18] sm:$0xff] }
 0x1df   :  { %1963 = vmatprep.subr.bf16.mxu0 %v2536_v29  ;;  %2045 = vmatprep.subr.bf16.mxu1 %v2538_v30  ;;  %v333_v29 = vld [vmem:[#allocation7 + $0x38] sm:$0xff]  ;;  %v2583_v30 = vcombine.low %v574_v15, %v578_v16  ;;  %v2340_v33 = vcombine.high %v328_v27, %v332_v57 }
 0x1e0   :  { %v2342_v34 = vcombine.high %v329_v28, %v333_v29  ;;  %v2341_v40 = vcombine.low %v329_v28, %v333_v29  ;;  %v388_v28 = vld [vmem:[#allocation7 + $0x1f0] sm:$0xff]  ;;  %v385_v29 = vld [vmem:[#allocation7 + $0x1d8] sm:$0xff] }
 0x1e2   :  { %1964 = vmatpush1.bf16.msra.mxu0 %v2535_v35  ;;  %2046 = vmatpush1.bf16.msra.mxu1 %v2537_v36  ;;  %v336_v35 = vld [vmem:[#allocation7 + $0x50] sm:$0xff] }
 0x1e3   :  { %1965 = vmatprep.subr.bf16.mxu0 %v2544_v37  ;;  %2047 = vmatprep.subr.bf16.mxu1 %v2546_v38  ;;  %v340_v36 = vld [vmem:[#allocation7 + $0x70] sm:$0xff]  ;;  %v341_v37 = vld [vmem:[#allocation7 + $0x78] sm:$0xff]  ;;  %v2339_v38 = vcombine.low %v328_v27, %v332_v57 }
 0x1e4   :  { %v2348_v41 = vcombine.high %v336_v35, %v340_v36  ;;  %v2350_v42 = vcombine.high %v337_v63, %v341_v37  ;;  %v2347_v47 = vcombine.low %v336_v35, %v340_v36  ;;  %v2349_v48 = vcombine.low %v337_v63, %v341_v37  ;;  %v384_v57 = vld [vmem:[#allocation7 + $0x1d0] sm:$0xff]  ;;  %v393_v63 = vld [vmem:[#allocation7 + $0x218] sm:$0xff] }
 0x1e5   :  { %v392_v35 = vld [vmem:[#allocation7 + $0x210] sm:$0xff]  ;;  %v397_v37 = vld [vmem:[#allocation7 + $0x238] sm:$0xff] }
 0x1e6   :  { %1966 = vmatpush1.bf16.msra.mxu0 %v2543_v43  ;;  %2048 = vmatpush1.bf16.msra.mxu1 %v2545_v44  ;;  %v344_v43 = vld [vmem:[#allocation7 + $0x90] sm:$0xff] }
 0x1e7   :  { %1967 = vmatprep.subr.bf16.mxu0 %v2552_v45  ;;  %2049 = vmatprep.subr.bf16.mxu1 %v2554_v46  ;;  %v348_v44 = vld [vmem:[#allocation7 + $0xb0] sm:$0xff]  ;;  %v345_v45 = vld [vmem:[#allocation7 + $0x98] sm:$0xff] }
 0x1e8   :  { %v349_v46 = vld [vmem:[#allocation7 + $0xb8] sm:$0xff]  ;;  %v2356_v49 = vcombine.high %v344_v43, %v348_v44  ;;  %v2355_v60 = vcombine.low %v344_v43, %v348_v44  ;;  %v396_v36 = vld [vmem:[#allocation7 + $0x230] sm:$0xff] }
 0x1e9   :  { %v2358_v50 = vcombine.high %v345_v45, %v349_v46  ;;  %v2357_v0 = vcombine.low %v345_v45, %v349_v46  ;;  %v400_v43 = vld [vmem:[#allocation7 + $0x250] sm:$0xff]  ;;  %v401_v45 = vld [vmem:[#allocation7 + $0x258] sm:$0xff] }
 0x1ea   :  { %1968 = vmatpush1.bf16.msra.mxu0 %v2551_v51  ;;  %2050 = vmatpush1.bf16.msra.mxu1 %v2553_v52  ;;  %v352_v51 = vld [vmem:[#allocation7 + $0xd0] sm:$0xff]  ;;  %v405_v46 = vld [vmem:[#allocation7 + $0x278] sm:$0xff] }
 0x1eb   :  { %1969 = vmatprep.subr.bf16.mxu0 %v2560_v53  ;;  %2051 = vmatprep.subr.bf16.mxu1 %v2562_v54  ;;  %v356_v52 = vld [vmem:[#allocation7 + $0xf0] sm:$0xff]  ;;  %v353_v53 = vld [vmem:[#allocation7 + $0xd8] sm:$0xff] }
 0x1ec   :  { %v357_v54 = vld [vmem:[#allocation7 + $0xf8] sm:$0xff]  ;;  %v2364_v61 = vcombine.high %v352_v51, %v356_v52  ;;  %v404_v44 = vld [vmem:[#allocation7 + $0x270] sm:$0xff] }
 0x1ed   :  { %v2366_v62 = vcombine.high %v353_v53, %v357_v54  ;;  %v2365_v6 = vcombine.low %v353_v53, %v357_v54  ;;  %v409_v53 = vld [vmem:[#allocation7 + $0x298] sm:$0xff] }
 0x1ee   :  { %1970 = vmatpush1.bf16.msra.mxu0 %v2559_v1  ;;  %2052 = vmatpush1.bf16.msra.mxu1 %v2561_v2  ;;  %v360_v1 = vld [vmem:[#allocation7 + $0x110] sm:$0xff]  ;;  %v413_v54 = vld [vmem:[#allocation7 + $0x2b8] sm:$0xff] }
 0x1ef   :  { %1971 = vmatprep.subr.bf16.mxu0 %v2568_v5  ;;  %2053 = vmatprep.subr.bf16.mxu1 %v2570_v3  ;;  %v364_v2 = vld [vmem:[#allocation7 + $0x130] sm:$0xff]  ;;  %v365_v5 = vld [vmem:[#allocation7 + $0x138] sm:$0xff]  ;;  %v2363_v3 = vcombine.low %v352_v51, %v356_v52 }
 0x1f0   :  { %v2372_v7 = vcombine.high %v360_v1, %v364_v2  ;;  %v408_v51 = vld [vmem:[#allocation7 + $0x290] sm:$0xff] }
 0x1f1   :  { %v412_v52 = vld [vmem:[#allocation7 + $0x2b0] sm:$0xff] }
 0x1f2   :  { %1972 = vmatpush1.bf16.msra.mxu0 %v2567_v10  ;;  %2054 = vmatpush1.bf16.msra.mxu1 %v2569_v11  ;;  %v372_v10 = vld [vmem:[#allocation7 + $0x170] sm:$0xff]  ;;  %v369_v11 = vld [vmem:[#allocation7 + $0x158] sm:$0xff] }
 0x1f3   :  { %1973 = vmatprep.subr.bf16.mxu0 %v2576_v13  ;;  %2055 = vmatprep.subr.bf16.mxu1 %v2578_v14  ;;  %v2371_v13 = vcombine.low %v360_v1, %v364_v2  ;;  %v2380_v15 = vcombine.high %v368_v9, %v372_v10  ;;  %v2382_v16 = vcombine.high %v369_v11, %v373_v12  ;;  %v416_v1 = vld [vmem:[#allocation7 + $0x2d0] sm:$0xff] }
 0x1f4   :  { %v2379_v23 = vcombine.low %v368_v9, %v372_v10  ;;  %v420_v2 = vld [vmem:[#allocation7 + $0x2f0] sm:$0xff] }
 0x1f5   :  { %v424_v9 = vld [vmem:[#allocation7 + $0x310] sm:$0xff] }
 0x1f6   :  { %1974 = vmatpush1.bf16.msra.mxu0 %v2575_v21  ;;  %2056 = vmatpush1.bf16.msra.mxu1 %v2577_v22  ;;  %v377_v21 = vld [vmem:[#allocation7 + $0x198] sm:$0xff]  ;;  %v428_v10 = vld [vmem:[#allocation7 + $0x330] sm:$0xff] }
 0x1f7   :  { %1975 = vmatprep.subr.bf16.mxu0 %v2584_v24  ;;  %2057 = vmatprep.subr.bf16.mxu1 %v2586_v26  ;;  %v381_v22 = vld [vmem:[#allocation7 + $0x1b8] sm:$0xff]  ;;  %v2381_v24 = vcombine.low %v369_v11, %v373_v12  ;;  %v2388_v26 = vcombine.high %v376_v19, %v380_v20 }
 0x1f8   :  { %v2390_v27 = vcombine.high %v377_v21, %v381_v22  ;;  %v2389_v32 = vcombine.low %v377_v21, %v381_v22  ;;  %v425_v11 = vld [vmem:[#allocation7 + $0x318] sm:$0xff] }
 0x1f9   :  { %v429_v12 = vld [vmem:[#allocation7 + $0x338] sm:$0xff] }
 0x1fa   :  { %1976 = vmatpush1.bf16.msra.mxu0 %v2583_v30  ;;  %2058 = vmatpush1.bf16.msra.mxu1 %v2585_v31  ;;  %v389_v30 = vld [vmem:[#allocation7 + $0x1f8] sm:$0xff]  ;;  %v2387_v31 = vcombine.low %v376_v19, %v380_v20  ;;  %v432_v19 = vld [vmem:[#allocation7 + $0x350] sm:$0xff] }
 0x1fb   :  { %2068 = vmatprep.subr.bf16.mxu0 %v2340_v33  ;;  %2150 = vmatprep.subr.bf16.mxu1 %v2342_v34  ;;  %v2396_v33 = vcombine.high %v384_v57, %v388_v28  ;;  %v2398_v34 = vcombine.high %v385_v29, %v389_v30  ;;  %v436_v20 = vld [vmem:[#allocation7 + $0x370] sm:$0xff]  ;;  %v433_v21 = vld [vmem:[#allocation7 + $0x358] sm:$0xff] }
 0x1fc   :  { %v437_v22 = vld [vmem:[#allocation7 + $0x378] sm:$0xff] }
 0x1fd   :  { %1978 = vmatmul.mubr.bf16.vlgmr.msra.gmra.mrb[4].mxu0 %v2915_v39  ;;  %2060 = vmatmul.mubr.bf16.vlgmr.msra.gmra.mrb[4].mxu1 %v2915_v39 }
 0x1fe   :  { %2069 = vmatpush1.bf16.msra.mxu0 %v2339_v38  ;;  %2100 = vmatprep.mubr.bf16.mxu0 %v2898_v17  ;;  %v2395_v38 = vcombine.low %v384_v57, %v388_v28  ;;  %v440_v57 = vld [vmem:[#allocation7 + $0x390] sm:$0xff] }
 0x1ff   :  { %2151 = vmatpush1.bf16.msra.mxu1 %v2341_v40  ;;  %2182 = vmatprep.mubr.bf16.mxu1 %v2898_v17  ;;  %v361_v17 = vld [vmem:[#allocation7 + $0x118] sm:$0xff]  ;;  %v2397_v40 = vcombine.low %v385_v29, %v389_v30  ;;  %v444_v28 = vld [vmem:[#allocation7 + $0x3b0] sm:$0xff] }
 0x200   :  { %2070 = vmatprep.subr.bf16.mxu0 %v2348_v41  ;;  %2152 = vmatprep.subr.bf16.mxu1 %v2350_v42  ;;  %v2374_v8 = vcombine.high %v361_v17, %v365_v5  ;;  %v2373_v14 = vcombine.low %v361_v17, %v365_v5  ;;  %v2404_v41 = vcombine.high %v392_v35, %v396_v36  ;;  %v417_v17 = vld [vmem:[#allocation7 + $0x2d8] sm:$0xff] }
 0x201   :  { %v2406_v42 = vcombine.high %v393_v63, %v397_v37  ;;  %v421_v5 = vld [vmem:[#allocation7 + $0x2f8] sm:$0xff] }
 0x202   :  { %2071 = vmatpush1.bf16.msra.mxu0 %v2347_v47  ;;  %v2403_v47 = vcombine.low %v392_v35, %v396_v36  ;;  %v441_v29 = vld [vmem:[#allocation7 + $0x398] sm:$0xff]  ;;  %v448_v35 = vld [vmem:[#allocation7 + $0x3d0] sm:$0xff] }
 0x203   :  { %2153 = vmatpush1.bf16.msra.mxu1 %v2349_v48  ;;  %2072 = vmatprep.subr.bf16.mxu0 %v2356_v49  ;;  %v2405_v48 = vcombine.low %v393_v63, %v397_v37  ;;  %v2412_v49 = vcombine.high %v400_v43, %v404_v44  ;;  %v445_v30 = vld [vmem:[#allocation7 + $0x3b8] sm:$0xff]  ;;  %v452_v36 = vld [vmem:[#allocation7 + $0x3f0] sm:$0xff] }
 0x204   :  { %2154 = vmatprep.subr.bf16.mxu1 %v2358_v50  ;;  %v2414_v50 = vcombine.high %v401_v45, %v405_v46  ;;  %v449_v63 = vld [vmem:[#allocation7 + $0x3d8] sm:$0xff] }
 0x205   :  { %v453_v37 = vld [vmem:[#allocation7 + $0x3f8] sm:$0xff] }
 0x206   :  { %2073 = vmatpush1.bf16.msra.mxu0 %v2355_v60  ;;  %v2411_v60 = vcombine.low %v400_v43, %v404_v44  ;;  %v456_v43 = vld [vmem:[#allocation7 + $0x410] sm:$0xff] }
 0x207   :  { %2155 = vmatpush1.bf16.msra.mxu1 %v2357_v0  ;;  %2074 = vmatprep.subr.bf16.mxu0 %v2364_v61  ;;  %v2413_v0 = vcombine.low %v401_v45, %v405_v46  ;;  %v2420_v61 = vcombine.high %v408_v51, %v412_v52  ;;  %v460_v44 = vld [vmem:[#allocation7 + $0x430] sm:$0xff]  ;;  %v457_v45 = vld [vmem:[#allocation7 + $0x418] sm:$0xff] }
 0x208   :  { %2156 = vmatprep.subr.bf16.mxu1 %v2366_v62  ;;  %v2422_v62 = vcombine.high %v409_v53, %v413_v54  ;;  %v461_v46 = vld [vmem:[#allocation7 + $0x438] sm:$0xff] }
 0x20a   :  { %2075 = vmatpush1.bf16.msra.mxu0 %v2363_v3  ;;  %v2419_v3 = vcombine.low %v408_v51, %v412_v52  ;;  %v464_v51 = vld [vmem:[#allocation7 + $0x450] sm:$0xff] }
 0x20b   :  { %2157 = vmatpush1.bf16.msra.mxu1 %v2365_v6  ;;  %2076 = vmatprep.subr.bf16.mxu0 %v2372_v7  ;;  %v2421_v6 = vcombine.low %v409_v53, %v413_v54  ;;  %v2428_v7 = vcombine.high %v416_v1, %v420_v2  ;;  %v468_v52 = vld [vmem:[#allocation7 + $0x470] sm:$0xff]  ;;  %v2467_v53 = vcombine.low %v456_v43, %v460_v44  ;;  %v465_v54 = vld [vmem:[#allocation7 + $0x458] sm:$0xff] }
 0x20c   :  { %2158 = vmatprep.subr.bf16.mxu1 %v2374_v8  ;;  %v2430_v8 = vcombine.high %v417_v17, %v421_v5 }
 0x20e   :  { %2077 = vmatpush1.bf16.msra.mxu0 %v2371_v13  ;;  %v2427_v13 = vcombine.low %v416_v1, %v420_v2  ;;  %v476_v1 = vld [vmem:[#allocation7 + $0x4b0] sm:$0xff] }
 0x20f   :  { %2159 = vmatpush1.bf16.msra.mxu1 %v2373_v14  ;;  %2078 = vmatprep.subr.bf16.mxu0 %v2380_v15  ;;  %v2429_v14 = vcombine.low %v417_v17, %v421_v5  ;;  %v2436_v15 = vcombine.high %v424_v9, %v428_v10  ;;  %v473_v17 = vld [vmem:[#allocation7 + $0x498] sm:$0xff] }
 0x210   :  { %2160 = vmatprep.subr.bf16.mxu1 %v2382_v16  ;;  %v2438_v16 = vcombine.high %v425_v11, %v429_v12  ;;  %v477_v5 = vld [vmem:[#allocation7 + $0x4b8] sm:$0xff] }
 0x212   :  { %2079 = vmatpush1.bf16.msra.mxu0 %v2379_v23  ;;  %v2435_v23 = vcombine.low %v424_v9, %v428_v10  ;;  %v480_v9 = vld [vmem:[#allocation7 + $0x4d0] sm:$0xff] }
 0x213   :  { %2161 = vmatpush1.bf16.msra.mxu1 %v2381_v24  ;;  %2080 = vmatprep.subr.bf16.mxu0 %v2388_v26  ;;  %v2437_v24 = vcombine.low %v425_v11, %v429_v12  ;;  %v2444_v26 = vcombine.high %v432_v19, %v436_v20  ;;  %v484_v10 = vld [vmem:[#allocation7 + $0x4f0] sm:$0xff]  ;;  %v481_v11 = vld [vmem:[#allocation7 + $0x4d8] sm:$0xff] }
 0x214   :  { %2162 = vmatprep.subr.bf16.mxu1 %v2390_v27  ;;  %v2446_v27 = vcombine.high %v433_v21, %v437_v22  ;;  %v485_v12 = vld [vmem:[#allocation7 + $0x4f8] sm:$0xff] }
 0x216   :  { %2081 = vmatpush1.bf16.msra.mxu0 %v2387_v31  ;;  %v2443_v31 = vcombine.low %v432_v19, %v436_v20  ;;  %v492_v19 = vld [vmem:[#allocation7 + $0x530] sm:$0xff]  ;;  %v489_v20 = vld [vmem:[#allocation7 + $0x518] sm:$0xff] }
 0x217   :  { %2163 = vmatpush1.bf16.msra.mxu1 %v2389_v32  ;;  %2082 = vmatprep.subr.bf16.mxu0 %v2396_v33  ;;  %v2445_v32 = vcombine.low %v433_v21, %v437_v22  ;;  %v2452_v33 = vcombine.high %v440_v57, %v444_v28  ;;  %v493_v21 = vld [vmem:[#allocation7 + $0x538] sm:$0xff]  ;;  %v2493_v22 = vcombine.low %v481_v11, %v485_v12 }
 0x218   :  { %2164 = vmatprep.subr.bf16.mxu1 %v2398_v34  ;;  %v2454_v34 = vcombine.high %v441_v29, %v445_v30 }
 0x21a   :  { %2083 = vmatpush1.bf16.msra.mxu0 %v2395_v38  ;;  %v2451_v38 = vcombine.low %v440_v57, %v444_v28  ;;  %v497_v57 = vld [vmem:[#allocation7 + $0x558] sm:$0xff] }
 0x21b   :  { %2165 = vmatpush1.bf16.msra.mxu1 %v2397_v40  ;;  %2084 = vmatprep.subr.bf16.mxu0 %v2404_v41  ;;  %v2453_v40 = vcombine.low %v441_v29, %v445_v30  ;;  %v2460_v41 = vcombine.high %v448_v35, %v452_v36  ;;  %v501_v28 = vld [vmem:[#allocation7 + $0x578] sm:$0xff]  ;;  %v2501_v30 = vcombine.low %v489_v20, %v493_v21 }
 0x21c   :  { %2166 = vmatprep.subr.bf16.mxu1 %v2406_v42  ;;  %v2462_v42 = vcombine.high %v449_v63, %v453_v37 }
 0x21e   :  { %2085 = vmatpush1.bf16.msra.mxu0 %v2403_v47  ;;  %v2459_v47 = vcombine.low %v448_v35, %v452_v36  ;;  %v505_v35 = vld [vmem:[#allocation7 + $0x598] sm:$0xff] }
 0x21f   :  { %2167 = vmatpush1.bf16.msra.mxu1 %v2405_v48  ;;  %2086 = vmatprep.subr.bf16.mxu0 %v2412_v49  ;;  %v2461_v48 = vcombine.low %v449_v63, %v453_v37  ;;  %v2468_v49 = vcombine.high %v456_v43, %v460_v44  ;;  %v509_v36 = vld [vmem:[#allocation7 + $0x5b8] sm:$0xff]  ;;  %v2509_v37 = vcombine.low %v497_v57, %v501_v28 }
 0x220   :  { %2168 = vmatprep.subr.bf16.mxu1 %v2414_v50  ;;  %v2470_v50 = vcombine.high %v457_v45, %v461_v46  ;;  %v513_v43 = vld [vmem:[#allocation7 + $0x5d8] sm:$0xff] }
 0x221   :  { %v517_v44 = vld [vmem:[#allocation7 + $0x5f8] sm:$0xff] }
 0x222   :  { %2087 = vmatpush1.bf16.msra.mxu0 %v2411_v60  ;;  %v469_v60 = vld [vmem:[#allocation7 + $0x478] sm:$0xff] }
 0x223   :  { %2169 = vmatpush1.bf16.msra.mxu1 %v2413_v0  ;;  %2088 = vmatprep.subr.bf16.mxu0 %v2420_v61  ;;  %v2469_v0 = vcombine.low %v457_v45, %v461_v46  ;;  %v2476_v61 = vcombine.high %v464_v51, %v468_v52  ;;  %v2478_v2 = vcombine.high %v465_v54, %v469_v60 }
 0x224   :  { %2170 = vmatprep.subr.bf16.mxu1 %v2422_v62  ;;  %v472_v62 = vld [vmem:[#allocation7 + $0x490] sm:$0xff]  ;;  %v2517_v46 = vcombine.low %v505_v35, %v509_v36 }
 0x226   :  { %2089 = vmatpush1.bf16.msra.mxu0 %v2419_v3  ;;  %v2475_v3 = vcombine.low %v464_v51, %v468_v52  ;;  %v521_v51 = vld [vmem:[#allocation7 + $0x618] sm:$0xff] }
 0x227   :  { %2171 = vmatpush1.bf16.msra.mxu1 %v2421_v6  ;;  %2090 = vmatprep.subr.bf16.mxu0 %v2428_v7  ;;  %v2477_v6 = vcombine.low %v465_v54, %v469_v60  ;;  %v2484_v7 = vcombine.high %v472_v62, %v476_v1  ;;  %v525_v52 = vld [vmem:[#allocation7 + $0x638] sm:$0xff]  ;;  %v2525_v54 = vcombine.low %v513_v43, %v517_v44 }
 0x228   :  { %2172 = vmatprep.subr.bf16.mxu1 %v2430_v8  ;;  %v2486_v8 = vcombine.high %v473_v17, %v477_v5 }
 0x22a   :  { %2091 = vmatpush1.bf16.msra.mxu0 %v2427_v13  ;;  %v2483_v13 = vcombine.low %v472_v62, %v476_v1  ;;  %v532_v62 = vld [vmem:[#allocation7 + $0x670] sm:$0xff]  ;;  %v529_v1 = vld [vmem:[#allocation7 + $0x658] sm:$0xff] }
 0x22b   :  { %2173 = vmatpush1.bf16.msra.mxu1 %v2429_v14  ;;  %2092 = vmatprep.subr.bf16.mxu0 %v2436_v15  ;;  %v2492_v14 = vcombine.high %v480_v9, %v484_v10  ;;  %v2494_v15 = vcombine.high %v481_v11, %v485_v12 }
 0x22c   :  { %2174 = vmatprep.subr.bf16.mxu1 %v2438_v16  ;;  %v488_v16 = vld [vmem:[#allocation7 + $0x510] sm:$0xff] }
 0x22d   :  { %v2499_v29 = vcombine.low %v488_v16, %v492_v19 }
 0x22e   :  { %2093 = vmatpush1.bf16.msra.mxu0 %v2435_v23  ;;  %v2500_v23 = vcombine.high %v488_v16, %v492_v19  ;;  %v545_v16 = vld [vmem:[#allocation7 + $0x6d8] sm:$0xff] }
 0x22f   :  { %2175 = vmatpush1.bf16.msra.mxu1 %v2437_v24  ;;  %2094 = vmatprep.subr.bf16.mxu0 %v2444_v26  ;;  %v2502_v24 = vcombine.high %v489_v20, %v493_v21  ;;  %v496_v26 = vld [vmem:[#allocation7 + $0x550] sm:$0xff]  ;;  %v549_v19 = vld [vmem:[#allocation7 + $0x6f8] sm:$0xff] }
 0x230   :  { %2176 = vmatprep.subr.bf16.mxu1 %v2446_v27  ;;  %v500_v27 = vld [vmem:[#allocation7 + $0x570] sm:$0xff] }
 0x231   :  { %v2507_v63 = vcombine.low %v496_v26, %v500_v27 }
 0x232   :  { %2095 = vmatpush1.bf16.msra.mxu0 %v2443_v31  ;;  %v2508_v31 = vcombine.high %v496_v26, %v500_v27  ;;  %v553_v26 = vld [vmem:[#allocation7 + $0x718] sm:$0xff] }
 0x233   :  { %2177 = vmatpush1.bf16.msra.mxu1 %v2445_v32  ;;  %2096 = vmatprep.subr.bf16.mxu0 %v2452_v33  ;;  %v2510_v32 = vcombine.high %v497_v57, %v501_v28  ;;  %v504_v33 = vld [vmem:[#allocation7 + $0x590] sm:$0xff]  ;;  %v557_v27 = vld [vmem:[#allocation7 + $0x738] sm:$0xff]  ;;  %v2557_v28 = vcombine.low %v545_v16, %v549_v19 }
 0x234   :  { %2178 = vmatprep.subr.bf16.mxu1 %v2454_v34  ;;  %v508_v34 = vld [vmem:[#allocation7 + $0x5b0] sm:$0xff] }
 0x235   :  { %v2515_v45 = vcombine.low %v504_v33, %v508_v34 }
 0x236   :  { %2097 = vmatpush1.bf16.msra.mxu0 %v2451_v38  ;;  %v2516_v38 = vcombine.high %v504_v33, %v508_v34  ;;  %v561_v33 = vld [vmem:[#allocation7 + $0x758] sm:$0xff] }
 0x237   :  { %2179 = vmatpush1.bf16.msra.mxu1 %v2453_v40  ;;  %2098 = vmatprep.subr.bf16.mxu0 %v2460_v41  ;;  %v2518_v40 = vcombine.high %v505_v35, %v509_v36  ;;  %v512_v41 = vld [vmem:[#allocation7 + $0x5d0] sm:$0xff]  ;;  %v565_v34 = vld [vmem:[#allocation7 + $0x778] sm:$0xff]  ;;  %v2565_v36 = vcombine.low %v553_v26, %v557_v27 }
 0x238   :  { %2180 = vmatprep.subr.bf16.mxu1 %v2462_v42  ;;  %v516_v42 = vld [vmem:[#allocation7 + $0x5f0] sm:$0xff] }
 0x23a   :  { %2099 = vmatpush1.bf16.msra.mxu0 %v2459_v47  ;;  %v2524_v47 = vcombine.high %v512_v41, %v516_v42 }
 0x23b   :  { %2181 = vmatpush1.bf16.msra.mxu1 %v2461_v48  ;;  %2109 = vmatprep.subr.bf16.mxu0 %v2468_v49  ;;  %v2526_v48 = vcombine.high %v513_v43, %v517_v44  ;;  %v520_v49 = vld [vmem:[#allocation7 + $0x610] sm:$0xff]  ;;  %v2573_v44 = vcombine.low %v561_v33, %v565_v34 }
 0x23c   :  { %2191 = vmatprep.subr.bf16.mxu1 %v2470_v50  ;;  %v524_v50 = vld [vmem:[#allocation7 + $0x630] sm:$0xff] }
 0x23d   :  { %2101 = vmatmul.mubr.bf16.vlgmr.msra.gmra.mrb[8].mxu0 %v2900_v18  ;;  %v2532_v60 = vcombine.high %v520_v49, %v524_v50 }
 0x23e   :  { %2183 = vmatmul.mubr.bf16.vlgmr.msra.gmra.mrb[8].mxu1 %v2900_v18  ;;  %2110 = vmatpush1.bf16.msra.mxu0 %v2467_v53  ;;  %v2485_v18 = vcombine.low %v473_v17, %v477_v5  ;;  %v2523_v53 = vcombine.low %v512_v41, %v516_v42  ;;  %v2531_v17 = vcombine.low %v520_v49, %v524_v50  ;;  %v569_v41 = vld [vmem:[#allocation7 + $0x798] sm:$0xff] }
 0x23f   :  { %2141 = vmatprep.mubr.bf16.mxu0 %v2904_v25  ;;  %2192 = vmatpush1.bf16.msra.mxu1 %v2469_v0  ;;  %v2534_v0 = vcombine.high %v521_v51, %v525_v52  ;;  %v2533_v5 = vcombine.low %v521_v51, %v525_v52  ;;  %v573_v42 = vld [vmem:[#allocation7 + $0x7b8] sm:$0xff] }
 0x240   :  { %2223 = vmatprep.mubr.bf16.mxu1 %v2904_v25  ;;  %2111 = vmatprep.subr.bf16.mxu0 %v2476_v61  ;;  %v2491_v25 = vcombine.low %v480_v9, %v484_v10  ;;  %v528_v61 = vld [vmem:[#allocation7 + $0x650] sm:$0xff]  ;;  %v537_v9 = vld [vmem:[#allocation7 + $0x698] sm:$0xff]  ;;  %v2581_v52 = vcombine.low %v569_v41, %v573_v42 }
 0x241   :  { %2193 = vmatprep.subr.bf16.mxu1 %v2478_v2  ;;  %v533_v2 = vld [vmem:[#allocation7 + $0x678] sm:$0xff]  ;;  %v2539_v11 = vcombine.low %v528_v61, %v532_v62 }
 0x242   :  { %2112 = vmatpush1.bf16.msra.mxu0 %v2475_v3  ;;  %v2540_v3 = vcombine.high %v528_v61, %v532_v62  ;;  %v541_v10 = vld [vmem:[#allocation7 + $0x6b8] sm:$0xff]  ;;  %v2541_v12 = vcombine.low %v529_v1, %v533_v2  ;;  %v582_v61 = vld [vmem:[%s2971_s4] sm:$0xff]  ;;  %v2778_v62 = vmov 1983009808   ;;  %s2779_s4 = smov [#allocation8]  }
 0x243   :  { %2194 = vmatpush1.bf16.msra.mxu1 %v2477_v6  ;;  %2113 = vmatprep.subr.bf16.mxu0 %v2484_v7  ;;  %v2542_v6 = vcombine.high %v529_v1, %v533_v2  ;;  %v536_v7 = vld [vmem:[#allocation7 + $0x690] sm:$0xff]  ;;  %v2549_v21 = vcombine.low %v537_v9, %v541_v10  ;;  %v577_v49 = vld [vmem:[#allocation7 + $0x7d8] sm:$0xff]  ;;  %v2251_v1 = vunpack.c.l.s4 %v2778_v62  ;;  %v587_v2 = vrot.slane %v582_v61, %v134_v56  ;;  %s2292_s13 = sshll.u32 %s2779_s4, 4  ;;  %s2293_s13 = int_to_ptr.vmem [resolvable:$true] %s2292_s13 }
 0x244   :  { %2195 = vmatprep.subr.bf16.mxu1 %v2486_v8  ;;  %v540_v8 = vld [vmem:[#allocation7 + $0x6b0] sm:$0xff]  ;;  %v581_v50 = vld [vmem:[#allocation7 + $0x7f8] sm:$0xff]  ;;  %s2717_s14 = scalar_lea.vmem %s2293_s13, 32  ;;  %p2722_p11 = scmp.lt.s32.totalorder %s2293_s13, %s2293_s13 }
 0x245   :  { %v2547_v20 = vcombine.low %v536_v7, %v540_v8  ;;  %p2718_p10 = scmp.ne.s32.totalorder %s2293_s13, %s2717_s14  ;;  %p2723_p12 = scmp.lt.s32.totalorder %s2717_s14, %s2717_s14 }
 0x246   :  { %2114 = vmatpush1.bf16.msra.mxu0 %v2483_v13  ;;  %v2548_v13 = vcombine.high %v536_v7, %v540_v8  ;;  %v2252_v7 = vunpack.c.0.s8 %v2251_v1 }
 0x247   :  { %2196 = vmatpush1.bf16.msra.mxu1 %v2485_v18  ;;  %2115 = vmatprep.subr.bf16.mxu0 %v2492_v14  ;;  %v2550_v18 = vcombine.high %v537_v9, %v541_v10  ;;  %v544_v14 = vld [vmem:[#allocation7 + $0x6d0] sm:$0xff]  ;;  %p2724_p13 = por %p2723_p12, %p2722_p11 }
 0x248   :  { %2197 = vmatprep.subr.bf16.mxu1 %v2494_v15  ;;  %v548_v15 = vld [vmem:[#allocation7 + $0x6f0] sm:$0xff] }
 0x249   :  { %v2555_v57 = vcombine.low %v544_v14, %v548_v15  ;;  %p2725_p0 = pnand %p2724_p13, %p2718_p10 }
 0x24a   :  { %2116 = vmatpush1.bf16.msra.mxu0 %v2491_v25  ;;  %v2556_v25 = vcombine.high %v544_v14, %v548_v15 }
 0x24b   :  { %2198 = vmatpush1.bf16.msra.mxu1 %v2493_v22  ;;  %2117 = vmatprep.subr.bf16.mxu0 %v2500_v23  ;;  %v2558_v22 = vcombine.high %v545_v16, %v549_v19  ;;  %v552_v23 = vld [vmem:[#allocation7 + $0x710] sm:$0xff] }
 0x24c   :  { %2199 = vmatprep.subr.bf16.mxu1 %v2502_v24  ;;  %v556_v24 = vld [vmem:[#allocation7 + $0x730] sm:$0xff] }
 0x24d   :  { %v2563_v35 = vcombine.low %v552_v23, %v556_v24 }
 0x24e   :  { %2118 = vmatpush1.bf16.msra.mxu0 %v2499_v29  ;;  %v2564_v29 = vcombine.high %v552_v23, %v556_v24 }
 0x24f   :  { %2200 = vmatpush1.bf16.msra.mxu1 %v2501_v30  ;;  %2119 = vmatprep.subr.bf16.mxu0 %v2508_v31  ;;  %v2566_v30 = vcombine.high %v553_v26, %v557_v27  ;;  %v560_v31 = vld [vmem:[#allocation7 + $0x750] sm:$0xff] }
 0x250   :  { %2201 = vmatprep.subr.bf16.mxu1 %v2510_v32  ;;  %v564_v32 = vld [vmem:[#allocation7 + $0x770] sm:$0xff] }
 0x251   :  { %v2571_v43 = vcombine.low %v560_v31, %v564_v32 }
 0x252   :  { %2120 = vmatpush1.bf16.msra.mxu0 %v2507_v63  ;;  %v2572_v63 = vcombine.high %v560_v31, %v564_v32 }
 0x253   :  { %2202 = vmatpush1.bf16.msra.mxu1 %v2509_v37  ;;  %2121 = vmatprep.subr.bf16.mxu0 %v2516_v38  ;;  %v2574_v37 = vcombine.high %v561_v33, %v565_v34  ;;  %v568_v38 = vld [vmem:[#allocation7 + $0x790] sm:$0xff] }
 0x254   :  { %2203 = vmatprep.subr.bf16.mxu1 %v2518_v40  ;;  %v572_v40 = vld [vmem:[#allocation7 + $0x7b0] sm:$0xff] }
 0x255   :  { %v2579_v51 = vcombine.low %v568_v38, %v572_v40 }
 0x256   :  { %2122 = vmatpush1.bf16.msra.mxu0 %v2515_v45  ;;  %v2580_v45 = vcombine.high %v568_v38, %v572_v40 }
 0x257   :  { %2204 = vmatpush1.bf16.msra.mxu1 %v2517_v46  ;;  %2123 = vmatprep.subr.bf16.mxu0 %v2524_v47  ;;  %v2582_v46 = vcombine.high %v569_v41, %v573_v42  ;;  %v576_v47 = vld [vmem:[#allocation7 + $0x7d0] sm:$0xff] }
 0x258   :  { %2205 = vmatprep.subr.bf16.mxu1 %v2526_v48  ;;  %v580_v48 = vld [vmem:[#allocation7 + $0x7f0] sm:$0xff] }
 0x25a   :  { %2124 = vmatpush1.bf16.msra.mxu0 %v2523_v53  ;;  %v2588_v53 = vcombine.high %v576_v47, %v580_v48 }
 0x25b   :  { %2206 = vmatpush1.bf16.msra.mxu1 %v2525_v54  ;;  %2125 = vmatprep.subr.bf16.mxu0 %v2532_v60  ;;  %v2590_v54 = vcombine.high %v577_v49, %v581_v50  ;;  %v2587_v60 = vcombine.low %v576_v47, %v580_v48 }
 0x25c   :  { %2207 = vmatprep.subr.bf16.mxu1 %v2534_v0  ;;  %v2589_v0 = vcombine.low %v577_v49, %v581_v50 }
 0x25e   :  { %2126 = vmatpush1.bf16.msra.mxu0 %v2531_v17  ;;  %v595_v17 = vrot.slane %v582_v61, %v142_v4 }
 0x25f   :  { %2208 = vmatpush1.bf16.msra.mxu1 %v2533_v5  ;;  %2127 = vmatprep.subr.bf16.mxu0 %v2540_v3  ;;  %v591_v5 = vrot.slane %v582_v61, %v138_v58  ;;  %v599_v3 = vrot.slane %v582_v61, %v146_v59  ;;  %v2255_v58 = vsub.s32 %v2252_v7, %v2877_v55 }
 0x260   :  { %2209 = vmatprep.subr.bf16.mxu1 %v2542_v6 }
 0x262   :  { %2128 = vmatpush1.bf16.msra.mxu0 %v2539_v11 }
 0x263   :  { %2210 = vmatpush1.bf16.msra.mxu1 %v2541_v12  ;;  %2129 = vmatprep.subr.bf16.mxu0 %v2548_v13 }
 0x264   :  { %2211 = vmatprep.subr.bf16.mxu1 %v2550_v18 }
 0x266   :  { %2130 = vmatpush1.bf16.msra.mxu0 %v2547_v20 }
 0x267   :  { %2212 = vmatpush1.bf16.msra.mxu1 %v2549_v21  ;;  %2131 = vmatprep.subr.bf16.mxu0 %v2556_v25 }
 0x268   :  { %2213 = vmatprep.subr.bf16.mxu1 %v2558_v22 }
 0x26a   :  { %2132 = vmatpush1.bf16.msra.mxu0 %v2555_v57 }
 0x26b   :  { %2214 = vmatpush1.bf16.msra.mxu1 %v2557_v28  ;;  %2133 = vmatprep.subr.bf16.mxu0 %v2564_v29 }
 0x26c   :  { %2215 = vmatprep.subr.bf16.mxu1 %v2566_v30 }
 0x26e   :  { %2134 = vmatpush1.bf16.msra.mxu0 %v2563_v35 }
 0x26f   :  { %2216 = vmatpush1.bf16.msra.mxu1 %v2565_v36  ;;  %2135 = vmatprep.subr.bf16.mxu0 %v2572_v63 }
 0x270   :  { %2217 = vmatprep.subr.bf16.mxu1 %v2574_v37 }
 0x272   :  { %2136 = vmatpush1.bf16.msra.mxu0 %v2571_v43 }
 0x273   :  { %2218 = vmatpush1.bf16.msra.mxu1 %v2573_v44  ;;  %2137 = vmatprep.subr.bf16.mxu0 %v2580_v45 }
 0x274   :  { %2219 = vmatprep.subr.bf16.mxu1 %v2582_v46 }
 0x276   :  { %2138 = vmatpush1.bf16.msra.mxu0 %v2579_v51 }
 0x277   :  { %2220 = vmatpush1.bf16.msra.mxu1 %v2581_v52  ;;  %2139 = vmatprep.subr.bf16.mxu0 %v2588_v53 }
 0x278   :  { %2221 = vmatprep.subr.bf16.mxu1 %v2590_v54 }
 0x27a   :  { %2140 = vmatpush1.bf16.msra.mxu0 %v2587_v60 }
 0x27b   :  { %2222 = vmatpush1.bf16.msra.mxu1 %v2589_v0 }
 0x27d   :  { %2142 = vmatmul.mubr.bf16.vlgmr.msra.gmra.mrb[8].mxu0 %v2915_v39 }
 0x27e   :  { %2224 = vmatmul.mubr.bf16.vlgmr.msra.gmra.mrb[8].mxu1 %v2915_v39 }
 0x2d0   :  { %v1979_v6 = vpop.f32.mrb[4].mxu0  ;;  %v2061_v39 = vpop.f32.mrb[4].mxu1 }
 0x2d1   :  { %v2591_v8 = vadd.f32 %v1979_v6, %v587_v2  ;;  %v2593_v9 = vadd.f32 %v2061_v39, %v595_v17  ;;  %v1981_v10 = vpop.f32.mrb[5].mxu0  ;;  %v2063_v11 = vpop.f32.mrb[5].mxu1 }
 0x2d2   :  { %v2592_v12 = vadd.f32 %v1981_v10, %v591_v5  ;;  %v2594_v13 = vadd.f32 %v2063_v11, %v599_v3  ;;  %v1983_v18 = vpop.f32.mrb[6].mxu0  ;;  %v2065_v56 = vpop.f32.mrb[6].mxu1 }
 0x2d3   :  { %v2232_v14 = vmax.f32 %v2591_v8, 0.0  ;;  %v2234_v15 = vmax.f32 %v2593_v9, 0.0  ;;  %v1984_v4 = vpop.f32.mrb[7].mxu0  ;;  %v2066_v16 = vpop.f32.mrb[7].mxu1 }
 0x2d4   :  { %v2233_v19 = vmax.f32 %v2592_v12, 0.0  ;;  %v2235_v20 = vmax.f32 %v2594_v13, 0.0 }
 0x2d6   :  { %v2248_v59 = vcombine.low %v2232_v14, %v2233_v19  ;;  %v2249_v21 = vcombine.low %v2234_v15, %v2235_v20 }
 0x2d8   :  { %v2256_v25 = vrot.slane %v2248_v59, %v2255_v58  ;;  %v2263_v22 = vrot.slane %v2249_v21, %v2255_v58 }
 0x2da   :  { %v2264_v23 = vcombine.low %v2256_v25, %v2263_v22 }
 0x2db   :  { %2728 = shalt.err (!%p2725_p0)
}
 0x2dc   :  { %s2729_s17 = scalar_lea.hbm %s2972_s5, 32 }
 0x2dd   :  { %p2730_p1 = scmp.ne.s32.totalorder %s2972_s5, %s2729_s17  ;;  %p2733_p2 = scmp.lt.u32.totalorder %s2729_s17, %s2972_s5 }
 0x2df   :  { %p2735_p3 = pnand %p2733_p2, %p2730_p1 }
 0x2e1   :  { %2738 = shalt.err (!%p2735_p3)
}
 0x2e2   :  { %2295 = dma.vmem_to_hbm [thread:$0]  %s2293_s13, 32, %s2972_s5, [#allocation4]   ;;  %2284 = vst [vmem:[#allocation9] sm:$0xff] %v2264_v23  ;;  %v602_v24 = vsub.s32 4, %v2877_v55  ;;  %v610_v26 = vsub.s32 6, %v2877_v55  ;;  %v606_v27 = vsub.s32 5, %v2877_v55 }
 0x2e3   :  { %v614_v57 = vsub.s32 7, %v2877_v55  ;;  %s2780_s5 = smov [#allocation9]  }
 0x2e4   :  { %v603_v28 = vrot.slane %v582_v61, %v602_v24  ;;  %v611_v29 = vrot.slane %v582_v61, %v610_v26  ;;  %v607_v30 = vrot.slane %v582_v61, %v606_v27  ;;  %s2302_s23 = sshll.u32 %s2780_s5, 4  ;;  %s2303_s23 = int_to_ptr.vmem [resolvable:$true] %s2302_s23 }
 0x2e5   :  { %v615_v31 = vrot.slane %v582_v61, %v614_v57  ;;  %s2739_s24 = scalar_lea.vmem %s2303_s23, 256  ;;  %p2744_p5 = scmp.lt.s32.totalorder %s2303_s23, %s2303_s23 }
 0x2e6   :  { %p2740_p4 = scmp.ne.s32.totalorder %s2303_s23, %s2739_s24  ;;  %p2745_p6 = scmp.lt.s32.totalorder %s2739_s24, %s2739_s24 }
 0x2e8   :  { %p2746_p7 = por %p2745_p6, %p2744_p5 }
 0x2ea   :  { %p2747_p8 = pnand %p2746_p7, %p2740_p4 }
 0x350   :  { %v2143_v32 = vpop.f32.mrb[8].mxu0 }
 0x351   :  { %v2595_v33 = vadd.f32 %v2143_v32, %v603_v28  ;;  %v2225_v34 = vpop.f32.mrb[8].mxu1  ;;  %v2145_v35 = vpop.f32.mrb[9].mxu0 }
 0x352   :  { %v2597_v36 = vadd.f32 %v2225_v34, %v611_v29  ;;  %v2596_v63 = vadd.f32 %v2145_v35, %v607_v30  ;;  %v2227_v37 = vpop.f32.mrb[9].mxu1  ;;  %v2147_v38 = vpop.f32.mrb[10].mxu0 }
 0x353   :  { %v2236_v40 = vmax.f32 %v2595_v33, 0.0  ;;  %v2598_v41 = vadd.f32 %v2227_v37, %v615_v31  ;;  %v2229_v42 = vpop.f32.mrb[10].mxu1  ;;  %v2148_v43 = vpop.f32.mrb[11].mxu0 }
 0x354   :  { %v2238_v44 = vmax.f32 %v2597_v36, 0.0  ;;  %v2237_v45 = vmax.f32 %v2596_v63, 0.0  ;;  %v2230_v46 = vpop.f32.mrb[11].mxu1 }
 0x355   :  { %v2239_v55 = vmax.f32 %v2598_v41, 0.0 }
 0x356   :  { %v2265_v47 = vcombine.low %v2236_v40, %v2237_v45 }
 0x357   :  { %v2266_v48 = vcombine.low %v2238_v44, %v2239_v55 }
 0x358   :  { %v2273_v49 = vrot.slane %v2265_v47, %v2255_v58 }
 0x359   :  { %v2280_v50 = vrot.slane %v2266_v48, %v2255_v58 }
 0x35b   :  { %v2281_v51 = vcombine.low %v2273_v49, %v2280_v50 }
 0x35d   :  { %2285 = vst [vmem:[#allocation9 + $0x8] sm:$0xff] %v2281_v51 }
 0x35e   :  { %2750 = shalt.err (!%p2747_p8)
}
 0x35f   :  { %s2751_s27 = scalar_lea.hbm %s2973_s6, 256 }
 0x360   :  { %p2752_p9 = scmp.ne.s32.totalorder %s2973_s6, %s2751_s27  ;;  %p2755_p10 = scmp.lt.u32.totalorder %s2751_s27, %s2973_s6 }
 0x362   :  { %p2757_p11 = pnand %p2755_p10, %p2752_p9 }
 0x364   :  { %2760 = shalt.err (!%p2757_p11)
}
 0x365   :  { %2305 = dma.vmem_to_hbm [thread:$0]  %s2303_s23, 256, %s2973_s6, [#allocation10]  }
 0x366   :  { %2765 = dma.done.wait [#allocation4], 32  }
 0x367   :  { %2766 = vsyncadd [#allocation4], 4294967264 }
 0x368   :  { %2767 = dma.done.wait [#allocation10], 256  }
 0x369   :  { %2768 = vsyncadd [#allocation10], 4294967040 }
 0x36a   :  { %2312 = vsyncpa [#allocation3], 1 }
 0x36b   :  { %2313 = vsyncpa [#allocation6], 1 }
 0x36c   :  { %2314 = vsyncpa [#allocation4], 1 }
 0x36d   :  { %2315 = vsyncpa [#allocation10], 1 }

</bundles_post_ra>
